<compile_context>
chip_gen: v5e
topology: v5e:2x2
jax: 0.10.0
libtpu: 0.0.40
codegen_flags: <defaults>
</compile_context>

<pallas_src>
import functools

import jax
import jax.numpy as jnp
from jax.experimental import pallas as pl
from jax.experimental.pallas import tpu as pltpu

# ----------------------------- config (small) -----------------------------
VOCAB = 100
HIDDEN = 32
HEADS = 4
HEAD_DIM = HIDDEN // HEADS
INTER = 64
LAYERS = 2
MAX_POS = 16
LN_EPS = 1e-12
POOLER_LAYER = LAYERS + 1   # analogue of output_layer == 13 in bert-base


# ----------------------------- fused Pallas kernel -----------------------------
def _bert_kernel(emb_ref, bias_ref, agg_ref, hmask_ref, emb_ln_ref,
                 wqkv_ref, bqkv_ref, wo_ref, bo_ref, ln1_ref,
                 w1_ref, b1_ref, w2_ref, b2_ref, ln2_ref,
                 wp_ref, bp_ref, o_ref,
                 *, batch, seq, n_layers, use_pooler, aggregator,
                 heads, scale, eps):
    """Single dense step: embeddings-LN -> n_layers encoder layers on a folded
    (B*S, H) slab -> aggregation (sum/mean via one tiny matmul, cls via slice) or
    pooler.  All intermediates live in vregs/VMEM."""
    bs = batch * seq

    def layer_norm(y, gamma, beta):
        mu = jnp.mean(y, axis=-1, keepdims=True)
        var = jnp.mean((y - mu) ** 2, axis=-1, keepdims=True)
        return (y - mu) * jax.lax.rsqrt(var + eps) * gamma + beta

    x = emb_ref[...].astype(jnp.float32)                           # (B*S, H)
    x = layer_norm(x, emb_ln_ref[0], emb_ln_ref[1])

    # ---- loop-invariant values, built once ----
    hmask = [hmask_ref[h] for h in range(heads)]                   # heads x (1, H)
    bias_full = jnp.concatenate([bias_ref[...]] * heads, axis=0)   # (heads*B*S, B*S)

    for l in range(n_layers):                                      # static unroll
        xb = x.astype(jnp.bfloat16)
        q = jnp.dot(xb, wqkv_ref[l, 0], preferred_element_type=jnp.float32) + bqkv_ref[l, 0]
        k = jnp.dot(xb, wqkv_ref[l, 1], preferred_element_type=jnp.float32) + bqkv_ref[l, 1]
        v = jnp.dot(xb, wqkv_ref[l, 2], preferred_element_type=jnp.float32) + bqkv_ref[l, 2]
        q = q * scale                                              # fold 1/sqrt(d) into Q

        # stacked-head masked Q slab: rows [h*bs:(h+1)*bs] carry only head h's lanes,
        # so ONE full-width contraction against K equals all per-head QK^T at once.
        q_stack = jnp.concatenate([q * hmask[h] for h in range(heads)], axis=0)  # (heads*BS, H)
        s = jnp.einsum("qd,kd->qk", q_stack, k,
                       preferred_element_type=jnp.float32)          # (heads*BS, BS)
        s = s + bias_full                                            # padding + block-diag mask
        s = s - jnp.max(s, axis=-1, keepdims=True)
        p = jnp.exp(s)
        p = p * pl.reciprocal(jnp.sum(p, axis=-1, keepdims=True), approx=True)
        pv = jnp.dot(p, v, preferred_element_type=jnp.float32)      # (heads*BS, H)

        # recombine head blocks: keep head h's lanes from its row block.
        ctx = pv[0:bs] * hmask[0]
        for h in range(1, heads):
            ctx = ctx + pv[h * bs:(h + 1) * bs] * hmask[h]

        attn = jnp.dot(ctx.astype(jnp.bfloat16), wo_ref[l],
                       preferred_element_type=jnp.float32) + bo_ref[l]
        attn = layer_norm(attn + x, ln1_ref[l, 0], ln1_ref[l, 1])

        inter = jnp.dot(attn.astype(jnp.bfloat16), w1_ref[l],
                        preferred_element_type=jnp.float32) + b1_ref[l]
        # TODO(synk): HF BERT uses exact erf-GELU; tanh approximation keeps everything
        # on guaranteed Mosaic transcendentals (EUP).
        inter = jax.nn.gelu(inter, approximate=True)
        ffn = jnp.dot(inter.astype(jnp.bfloat16), w2_ref[l],
                      preferred_element_type=jnp.float32) + b2_ref[l]
        x = layer_norm(ffn + attn, ln2_ref[l, 0], ln2_ref[l, 1])

    if use_pooler or aggregator == "cls":
        # CLS token = static sublane slice per batch element (no selection matmul).
        cls_rows = jnp.concatenate([x[b * seq:b * seq + 1, :] for b in range(batch)],
                                   axis=0)                           # (B, H)
        if use_pooler:
            out = jnp.tanh(jnp.dot(cls_rows.astype(jnp.bfloat16), wp_ref[...],
                                   preferred_element_type=jnp.float32) + bp_ref[...])
        else:
            out = cls_rows
    else:
        # sum / mean: one (B, B*S) @ (B*S, H) matmul with the mask (and 1/len for mean)
        # folded into the aggregation matrix built in the wrapper.
        out = jnp.dot(agg_ref[...], x, preferred_element_type=jnp.float32)   # (B, H)

    o_ref[...] = out.astype(o_ref.dtype)


# ----------------------------- parameters -----------------------------
def init_params(key):
    def nrm(k, shape, dtype=jnp.float32):
        return (0.02 * jax.random.normal(k, shape, jnp.float32)).astype(dtype)

    ks = jax.random.split(key, 8)
    ln_init = jnp.concatenate([jnp.ones((1, 1, HIDDEN), jnp.float32),
                               jnp.zeros((1, 1, HIDDEN), jnp.float32)], axis=0)   # (2,1,H)
    wdt = jnp.bfloat16   # matmul weights stored bf16 (half DMA bytes, native MXU path)
    return {
        "word_emb": nrm(ks[0], (VOCAB, HIDDEN)),
        "pos_emb": nrm(ks[1], (MAX_POS, HIDDEN)),
        "type_emb": nrm(ks[2], (2, HIDDEN)),
        "emb_ln": ln_init,                                            # (2, 1, H)
        "wqkv": nrm(ks[3], (LAYERS, 3, HIDDEN, HIDDEN), wdt),         # q/k/v stacked
        "bqkv": jnp.zeros((LAYERS, 3, 1, HIDDEN), jnp.float32),
        "wo": nrm(ks[4], (LAYERS, HIDDEN, HIDDEN), wdt),
        "bo": jnp.zeros((LAYERS, 1, HIDDEN), jnp.float32),
        "ln1": jnp.tile(ln_init[None], (LAYERS, 1, 1, 1)),            # (L, 2, 1, H)
        "w1": nrm(ks[5], (LAYERS, HIDDEN, INTER), wdt),
        "b1": jnp.zeros((LAYERS, 1, INTER), jnp.float32),
        "w2": nrm(ks[6], (LAYERS, INTER, HIDDEN), wdt),
        "b2": jnp.zeros((LAYERS, 1, HIDDEN), jnp.float32),
        "ln2": jnp.tile(ln_init[None], (LAYERS, 1, 1, 1)),
        "wp": nrm(ks[7], (HIDDEN, HIDDEN), wdt),
        "bp": jnp.zeros((1, HIDDEN), jnp.float32),
    }


# ----------------------------- forward -----------------------------
@functools.partial(jax.jit, static_argnames=("output_layer", "aggregator"))
def bert_forward(params, input_ids, attention_mask, *, output_layer, aggregator):
    assert 0 <= output_layer <= POOLER_LAYER
    assert aggregator in ("sum", "mean", "cls")
    B, S = input_ids.shape
    BS = B * S

    use_pooler = output_layer == POOLER_LAYER
    n_layers = LAYERS if use_pooler else min(output_layer, LAYERS)

    # Embedding gather + sum is XLA glue; everything else runs in one fused kernel.
    we = jnp.take(params["word_emb"], input_ids, axis=0)               # (B, S, H)
    pe = params["pos_emb"][:S][None, :, :]
    te = params["type_emb"][0][None, None, :]                          # token_type_ids = 0
    emb = (we + pe + te).astype(jnp.float32).reshape(BS, HIDDEN)       # folded (B*S, H)

    mask = attention_mask.astype(jnp.float32)                          # (B, S)
    mask_flat = mask.reshape(BS)
    batch_ids = jnp.repeat(jnp.arange(B), S)                           # (BS,)
    same_batch = batch_ids[:, None] == batch_ids[None, :]
    # HF-style additive key padding mask within a batch element; cross-batch fully masked.
    attn_bias = jnp.where(same_batch,
                          (1.0 - mask_flat)[None, :] * -10000.0,
                          jnp.float32(-1e9))                           # (BS, BS)

    # aggregation matrix for sum / mean (block-diag masked rows, mean normalization folded in)
    sel = (batch_ids[None, :] == jnp.arange(B)[:, None]).astype(jnp.float32)   # (B, BS)
    agg = sel * mask_flat[None, :]
    if aggregator == "mean":
        agg = agg / jnp.sum(agg, axis=-1, keepdims=True)

    # per-head lane masks, built once on the host side
    lane = jnp.arange(HIDDEN)
    head_mask = jnp.stack(
        [((lane >= h * HEAD_DIM) & (lane < (h + 1) * HEAD_DIM)).astype(jnp.float32)[None, :]
         for h in range(HEADS)], axis=0)                               # (HEADS, 1, HIDDEN)

    kernel = functools.partial(
        _bert_kernel,
        batch=B, seq=S, n_layers=n_layers, use_pooler=use_pooler,
        aggregator=aggregator, heads=HEADS,
        scale=1.0 / (HEAD_DIM ** 0.5), eps=LN_EPS)

    def full(shape):                                   # whole array as one VMEM block
        nd = len(shape)
        return pl.BlockSpec(shape, lambda i, nd=nd: (0,) * nd)

    operands = (emb, attn_bias, agg, head_mask, params["emb_ln"],
                params["wqkv"], params["bqkv"], params["wo"], params["bo"], params["ln1"],
                params["w1"], params["b1"], params["w2"], params["b2"], params["ln2"],
                params["wp"], params["bp"])

    out = pl.pallas_call(
        kernel,
        out_shape=jax.ShapeDtypeStruct((B, HIDDEN), jnp.float32),
        grid=(1,),                                      # single dense step (see header)
        in_specs=[full(op.shape) for op in operands],
        out_specs=pl.BlockSpec((B, HIDDEN), lambda i: (0, 0)),
        compiler_params=pltpu.CompilerParams(dimension_semantics=("arbitrary",)),
    )(*operands)

    return out                                                         # (B, H)


# ----------------------------- demo -----------------------------
if __name__ == "__main__":
    B, S = 2, 8
    key = jax.random.PRNGKey(0)
    pkey, ikey = jax.random.split(key)

    params = init_params(pkey)
    input_ids = jax.random.randint(ikey, (B, S), 0, VOCAB)
    lengths = jnp.array([S, 5])
    attention_mask = (jnp.arange(S)[None, :] < lengths[:, None]).astype(jnp.float32)

    out_mean = bert_forward(params, input_ids, attention_mask,
                            output_layer=LAYERS, aggregator="mean")
    out_sum = bert_forward(params, input_ids, attention_mask,
                           output_layer=1, aggregator="sum")
    out_cls = bert_forward(params, input_ids, attention_mask,
                           output_layer=0, aggregator="cls")
    out_pool = bert_forward(params, input_ids, attention_mask,
                            output_layer=POOLER_LAYER, aggregator="sum")

    jax.block_until_ready((out_mean, out_sum, out_cls, out_pool))
    assert out_mean.shape == (B, HIDDEN) and out_sum.shape == (B, HIDDEN)
    assert out_cls.shape == (B, HIDDEN) and out_pool.shape == (B, HIDDEN)
    assert all(bool(jnp.all(jnp.isfinite(o))) for o in (out_mean, out_sum, out_cls, out_pool))
    print("KERNEL_OK")
</pallas_src>

<mosaic_0001>
module attributes {stable_mosaic.version = 11 : i64} {
  func.func @_bert_kernel(%arg0: i32, %arg1: memref<16x32xf32, #tpu.memory_space<vmem>>, %arg2: memref<16x16xf32, #tpu.memory_space<vmem>>, %arg3: memref<2x16xf32, #tpu.memory_space<vmem>>, %arg4: memref<4x1x32xf32, #tpu.memory_space<vmem>>, %arg5: memref<2x1x32xf32, #tpu.memory_space<vmem>>, %arg6: memref<2x3x32x32xbf16, #tpu.memory_space<vmem>>, %arg7: memref<2x3x1x32xf32, #tpu.memory_space<vmem>>, %arg8: memref<2x32x32xbf16, #tpu.memory_space<vmem>>, %arg9: memref<2x1x32xf32, #tpu.memory_space<vmem>>, %arg10: memref<2x2x1x32xf32, #tpu.memory_space<vmem>>, %arg11: memref<2x32x64xbf16, #tpu.memory_space<vmem>>, %arg12: memref<2x1x64xf32, #tpu.memory_space<vmem>>, %arg13: memref<2x64x32xbf16, #tpu.memory_space<vmem>>, %arg14: memref<2x1x32xf32, #tpu.memory_space<vmem>>, %arg15: memref<2x2x1x32xf32, #tpu.memory_space<vmem>>, %arg16: memref<32x32xbf16, #tpu.memory_space<vmem>>, %arg17: memref<1x32xf32, #tpu.memory_space<vmem>>, %arg18: memref<2x32xf32, #tpu.memory_space<vmem>>) attributes {dimension_semantics = [#tpu.dimension_semantics<arbitrary>], iteration_bounds = array<i64: 1>, scalar_prefetch = 0 : i64, scratch_operands = 0 : i64, tpu.core_type = #tpu.core_type<tc>, window_params = [{pipeline_mode = #tpu.pipeline_mode<synchronous>, transform_indices = @transform_0, window_bounds = array<i64: 16, 32>}, {pipeline_mode = #tpu.pipeline_mode<synchronous>, transform_indices = @transform_1, window_bounds = array<i64: 16, 16>}, {pipeline_mode = #tpu.pipeline_mode<synchronous>, transform_indices = @transform_2, window_bounds = array<i64: 2, 16>}, {pipeline_mode = #tpu.pipeline_mode<synchronous>, transform_indices = @transform_3, window_bounds = array<i64: 4, 1, 32>}, {pipeline_mode = #tpu.pipeline_mode<synchronous>, transform_indices = @transform_4, window_bounds = array<i64: 2, 1, 32>}, {pipeline_mode = #tpu.pipeline_mode<synchronous>, transform_indices = @transform_5, window_bounds = array<i64: 2, 3, 32, 32>}, {pipeline_mode = #tpu.pipeline_mode<synchronous>, transform_indices = @transform_6, window_bounds = array<i64: 2, 3, 1, 32>}, {pipeline_mode = #tpu.pipeline_mode<synchronous>, transform_indices = @transform_7, window_bounds = array<i64: 2, 32, 32>}, {pipeline_mode = #tpu.pipeline_mode<synchronous>, transform_indices = @transform_8, window_bounds = array<i64: 2, 1, 32>}, {pipeline_mode = #tpu.pipeline_mode<synchronous>, transform_indices = @transform_9, window_bounds = array<i64: 2, 2, 1, 32>}, {pipeline_mode = #tpu.pipeline_mode<synchronous>, transform_indices = @transform_10, window_bounds = array<i64: 2, 32, 64>}, {pipeline_mode = #tpu.pipeline_mode<synchronous>, transform_indices = @transform_11, window_bounds = array<i64: 2, 1, 64>}, {pipeline_mode = #tpu.pipeline_mode<synchronous>, transform_indices = @transform_12, window_bounds = array<i64: 2, 64, 32>}, {pipeline_mode = #tpu.pipeline_mode<synchronous>, transform_indices = @transform_13, window_bounds = array<i64: 2, 1, 32>}, {pipeline_mode = #tpu.pipeline_mode<synchronous>, transform_indices = @transform_14, window_bounds = array<i64: 2, 2, 1, 32>}, {pipeline_mode = #tpu.pipeline_mode<synchronous>, transform_indices = @transform_15, window_bounds = array<i64: 32, 32>}, {pipeline_mode = #tpu.pipeline_mode<synchronous>, transform_indices = @transform_16, window_bounds = array<i64: 1, 32>}, {pipeline_mode = #tpu.pipeline_mode<synchronous>, transform_indices = @transform_17, window_bounds = array<i64: 2, 32>}]} {
    %c0 = arith.constant 0 : index
    %c0_0 = arith.constant 0 : index
    %0 = vector.load %arg1[%c0, %c0_0] : memref<16x32xf32, #tpu.memory_space<vmem>>, vector<16x32xf32>
    %c0_1 = arith.constant 0 : index
    %c0_2 = arith.constant 0 : index
    %c0_3 = arith.constant 0 : index
    %1 = vector.load %arg5[%c0_1, %c0_2, %c0_3] : memref<2x1x32xf32, #tpu.memory_space<vmem>>, vector<1x1x32xf32>
    %2 = vector.shape_cast %1 : vector<1x1x32xf32> to vector<1x32xf32>
    %c1 = arith.constant 1 : index
    %c0_4 = arith.constant 0 : index
    %c0_5 = arith.constant 0 : index
    %3 = vector.load %arg5[%c1, %c0_4, %c0_5] : memref<2x1x32xf32, #tpu.memory_space<vmem>>, vector<1x1x32xf32>
    %4 = vector.shape_cast %3 : vector<1x1x32xf32> to vector<1x32xf32>
    %cst = arith.constant dense<0.000000e+00> : vector<16xf32>
    %5 = vector.multi_reduction <add>, %0, %cst [1] : vector<16x32xf32> to vector<16xf32>
    %6 = vector.shape_cast %5 : vector<16xf32> to vector<16x1xf32>
    %cst_6 = arith.constant 3.200000e+01 : f32
    %7 = vector.broadcast %cst_6 : f32 to vector<16x1xf32>
    %8 = arith.divf %6, %7 : vector<16x1xf32>
    %9 = vector.broadcast %8 : vector<16x1xf32> to vector<16x32xf32>
    %10 = arith.subf %0, %9 : vector<16x32xf32>
    %11 = arith.mulf %10, %10 : vector<16x32xf32>
    %cst_7 = arith.constant dense<0.000000e+00> : vector<16xf32>
    %12 = vector.multi_reduction <add>, %11, %cst_7 [1] : vector<16x32xf32> to vector<16xf32>
    %13 = vector.shape_cast %12 : vector<16xf32> to vector<16x1xf32>
    %cst_8 = arith.constant 3.200000e+01 : f32
    %14 = vector.broadcast %cst_8 : f32 to vector<16x1xf32>
    %15 = arith.divf %13, %14 : vector<16x1xf32>
    %16 = vector.broadcast %8 : vector<16x1xf32> to vector<16x32xf32>
    %17 = arith.subf %0, %16 : vector<16x32xf32>
    %cst_9 = arith.constant 9.99999996E-13 : f32
    %18 = vector.broadcast %cst_9 : f32 to vector<16x1xf32>
    %19 = arith.addf %15, %18 : vector<16x1xf32>
    %20 = math.rsqrt %19 : vector<16x1xf32>
    %21 = vector.broadcast %20 : vector<16x1xf32> to vector<16x32xf32>
    %22 = arith.mulf %17, %21 : vector<16x32xf32>
    %23 = vector.broadcast %2 : vector<1x32xf32> to vector<16x32xf32>
    %24 = arith.mulf %22, %23 : vector<16x32xf32>
    %25 = vector.broadcast %4 : vector<1x32xf32> to vector<16x32xf32>
    %26 = arith.addf %24, %25 : vector<16x32xf32>
    %c0_10 = arith.constant 0 : index
    %c0_11 = arith.constant 0 : index
    %c0_12 = arith.constant 0 : index
    %27 = vector.load %arg4[%c0_10, %c0_11, %c0_12] : memref<4x1x32xf32, #tpu.memory_space<vmem>>, vector<1x1x32xf32>
    %28 = vector.shape_cast %27 : vector<1x1x32xf32> to vector<1x32xf32>
    %c1_13 = arith.constant 1 : index
    %c0_14 = arith.constant 0 : index
    %c0_15 = arith.constant 0 : index
    %29 = vector.load %arg4[%c1_13, %c0_14, %c0_15] : memref<4x1x32xf32, #tpu.memory_space<vmem>>, vector<1x1x32xf32>
    %30 = vector.shape_cast %29 : vector<1x1x32xf32> to vector<1x32xf32>
    %c2 = arith.constant 2 : index
    %c0_16 = arith.constant 0 : index
    %c0_17 = arith.constant 0 : index
    %31 = vector.load %arg4[%c2, %c0_16, %c0_17] : memref<4x1x32xf32, #tpu.memory_space<vmem>>, vector<1x1x32xf32>
    %32 = vector.shape_cast %31 : vector<1x1x32xf32> to vector<1x32xf32>
    %c3 = arith.constant 3 : index
    %c0_18 = arith.constant 0 : index
    %c0_19 = arith.constant 0 : index
    %33 = vector.load %arg4[%c3, %c0_18, %c0_19] : memref<4x1x32xf32, #tpu.memory_space<vmem>>, vector<1x1x32xf32>
    %34 = vector.shape_cast %33 : vector<1x1x32xf32> to vector<1x32xf32>
    %c0_20 = arith.constant 0 : index
    %c0_21 = arith.constant 0 : index
    %35 = vector.load %arg2[%c0_20, %c0_21] : memref<16x16xf32, #tpu.memory_space<vmem>>, vector<16x16xf32>
    %36 = tpu.concatenate %35, %35, %35, %35 in 0 : vector<16x16xf32>, vector<16x16xf32>, vector<16x16xf32>, vector<16x16xf32> -> vector<64x16xf32>
    %37 = arith.truncf %26 : vector<16x32xf32> to vector<16x32xbf16>
    %c0_22 = arith.constant 0 : index
    %c0_23 = arith.constant 0 : index
    %c0_24 = arith.constant 0 : index
    %c0_25 = arith.constant 0 : index
    %38 = vector.load %arg6[%c0_22, %c0_23, %c0_24, %c0_25] : memref<2x3x32x32xbf16, #tpu.memory_space<vmem>>, vector<1x1x32x32xbf16>
    %39 = vector.shape_cast %38 : vector<1x1x32x32xbf16> to vector<32x32xbf16>
    %cst_26 = arith.constant dense<0.000000e+00> : vector<16x32xf32>
    %40 = tpu.matmul %37, %39, %cst_26 {dimension_numbers = #tpu.dot_dimension_numbers<[1], [0], [0], [1], [0, 0, 1, 1], [], []>} : vector<16x32xbf16>, vector<32x32xbf16>, vector<16x32xf32> -> vector<16x32xf32>
    %c0_27 = arith.constant 0 : index
    %c0_28 = arith.constant 0 : index
    %c0_29 = arith.constant 0 : index
    %c0_30 = arith.constant 0 : index
    %41 = vector.load %arg7[%c0_27, %c0_28, %c0_29, %c0_30] : memref<2x3x1x32xf32, #tpu.memory_space<vmem>>, vector<1x1x1x32xf32>
    %42 = vector.shape_cast %41 : vector<1x1x1x32xf32> to vector<1x32xf32>
    %43 = vector.broadcast %42 : vector<1x32xf32> to vector<16x32xf32>
    %44 = arith.addf %40, %43 : vector<16x32xf32>
    %c0_31 = arith.constant 0 : index
    %c1_32 = arith.constant 1 : index
    %c0_33 = arith.constant 0 : index
    %c0_34 = arith.constant 0 : index
    %45 = vector.load %arg6[%c0_31, %c1_32, %c0_33, %c0_34] : memref<2x3x32x32xbf16, #tpu.memory_space<vmem>>, vector<1x1x32x32xbf16>
    %46 = vector.shape_cast %45 : vector<1x1x32x32xbf16> to vector<32x32xbf16>
    %cst_35 = arith.constant dense<0.000000e+00> : vector<16x32xf32>
    %47 = tpu.matmul %37, %46, %cst_35 {dimension_numbers = #tpu.dot_dimension_numbers<[1], [0], [0], [1], [0, 0, 1, 1], [], []>} : vector<16x32xbf16>, vector<32x32xbf16>, vector<16x32xf32> -> vector<16x32xf32>
    %c0_36 = arith.constant 0 : index
    %c1_37 = arith.constant 1 : index
    %c0_38 = arith.constant 0 : index
    %c0_39 = arith.constant 0 : index
    %48 = vector.load %arg7[%c0_36, %c1_37, %c0_38, %c0_39] : memref<2x3x1x32xf32, #tpu.memory_space<vmem>>, vector<1x1x1x32xf32>
    %49 = vector.shape_cast %48 : vector<1x1x1x32xf32> to vector<1x32xf32>
    %50 = vector.broadcast %49 : vector<1x32xf32> to vector<16x32xf32>
    %51 = arith.addf %47, %50 : vector<16x32xf32>
    %c0_40 = arith.constant 0 : index
    %c2_41 = arith.constant 2 : index
    %c0_42 = arith.constant 0 : index
    %c0_43 = arith.constant 0 : index
    %52 = vector.load %arg6[%c0_40, %c2_41, %c0_42, %c0_43] : memref<2x3x32x32xbf16, #tpu.memory_space<vmem>>, vector<1x1x32x32xbf16>
    %53 = vector.shape_cast %52 : vector<1x1x32x32xbf16> to vector<32x32xbf16>
    %cst_44 = arith.constant dense<0.000000e+00> : vector<16x32xf32>
    %54 = tpu.matmul %37, %53, %cst_44 {dimension_numbers = #tpu.dot_dimension_numbers<[1], [0], [0], [1], [0, 0, 1, 1], [], []>} : vector<16x32xbf16>, vector<32x32xbf16>, vector<16x32xf32> -> vector<16x32xf32>
    %c0_45 = arith.constant 0 : index
    %c2_46 = arith.constant 2 : index
    %c0_47 = arith.constant 0 : index
    %c0_48 = arith.constant 0 : index
    %55 = vector.load %arg7[%c0_45, %c2_46, %c0_47, %c0_48] : memref<2x3x1x32xf32, #tpu.memory_space<vmem>>, vector<1x1x1x32xf32>
    %56 = vector.shape_cast %55 : vector<1x1x1x32xf32> to vector<1x32xf32>
    %57 = vector.broadcast %56 : vector<1x32xf32> to vector<16x32xf32>
    %58 = arith.addf %54, %57 : vector<16x32xf32>
    %cst_49 = arith.constant 0.353553385 : f32
    %59 = vector.broadcast %cst_49 : f32 to vector<16x32xf32>
    %60 = arith.mulf %44, %59 : vector<16x32xf32>
    %61 = vector.broadcast %28 : vector<1x32xf32> to vector<16x32xf32>
    %62 = arith.mulf %60, %61 : vector<16x32xf32>
    %63 = vector.broadcast %30 : vector<1x32xf32> to vector<16x32xf32>
    %64 = arith.mulf %60, %63 : vector<16x32xf32>
    %65 = vector.broadcast %32 : vector<1x32xf32> to vector<16x32xf32>
    %66 = arith.mulf %60, %65 : vector<16x32xf32>
    %67 = vector.broadcast %34 : vector<1x32xf32> to vector<16x32xf32>
    %68 = arith.mulf %60, %67 : vector<16x32xf32>
    %69 = tpu.concatenate %62, %64, %66, %68 in 0 : vector<16x32xf32>, vector<16x32xf32>, vector<16x32xf32>, vector<16x32xf32> -> vector<64x32xf32>
    "tpu.trace_start"() <{level = 10 : i32, message = "qd,kd->qk"}> : () -> ()
    %cst_50 = arith.constant dense<0.000000e+00> : vector<64x16xf32>
    %70 = tpu.matmul %69, %51, %cst_50 {dimension_numbers = #tpu.dot_dimension_numbers<[1], [1], [0], [0], [0, 0, 1, 0], [], []>} : vector<64x32xf32>, vector<16x32xf32>, vector<64x16xf32> -> vector<64x16xf32>
    "tpu.trace_stop"() : () -> ()
    %71 = arith.addf %70, %36 : vector<64x16xf32>
    %cst_51 = arith.constant dense<0xFF800000> : vector<64xf32>
    %72 = vector.multi_reduction <maximumf>, %71, %cst_51 [1] : vector<64x16xf32> to vector<64xf32>
    %73 = vector.shape_cast %72 : vector<64xf32> to vector<64x1xf32>
    %74 = vector.broadcast %73 : vector<64x1xf32> to vector<64x16xf32>
    %75 = arith.subf %71, %74 : vector<64x16xf32>
    %76 = math.exp %75 : vector<64x16xf32>
    %cst_52 = arith.constant dense<0.000000e+00> : vector<64xf32>
    %77 = vector.multi_reduction <add>, %76, %cst_52 [1] : vector<64x16xf32> to vector<64xf32>
    %78 = vector.shape_cast %77 : vector<64xf32> to vector<64x1xf32>
    %79 = tpu.reciprocal %78 {approx = true} : vector<64x1xf32> -> vector<64x1xf32>
    %80 = vector.broadcast %79 : vector<64x1xf32> to vector<64x16xf32>
    %81 = arith.mulf %76, %80 : vector<64x16xf32>
    %cst_53 = arith.constant dense<0.000000e+00> : vector<64x32xf32>
    %82 = tpu.matmul %81, %58, %cst_53 {dimension_numbers = #tpu.dot_dimension_numbers<[1], [0], [0], [1], [0, 0, 1, 1], [], []>} : vector<64x16xf32>, vector<16x32xf32>, vector<64x32xf32> -> vector<64x32xf32>
    %83 = vector.extract_strided_slice %82 {offsets = [0, 0], sizes = [16, 32], strides = [1, 1]} : vector<64x32xf32> to vector<16x32xf32>
    %84 = vector.broadcast %28 : vector<1x32xf32> to vector<16x32xf32>
    %85 = arith.mulf %83, %84 : vector<16x32xf32>
    %86 = vector.extract_strided_slice %82 {offsets = [16, 0], sizes = [16, 32], strides = [1, 1]} : vector<64x32xf32> to vector<16x32xf32>
    %87 = vector.broadcast %30 : vector<1x32xf32> to vector<16x32xf32>
    %88 = arith.mulf %86, %87 : vector<16x32xf32>
    %89 = arith.addf %85, %88 : vector<16x32xf32>
    %90 = vector.extract_strided_slice %82 {offsets = [32, 0], sizes = [16, 32], strides = [1, 1]} : vector<64x32xf32> to vector<16x32xf32>
    %91 = vector.broadcast %32 : vector<1x32xf32> to vector<16x32xf32>
    %92 = arith.mulf %90, %91 : vector<16x32xf32>
    %93 = arith.addf %89, %92 : vector<16x32xf32>
    %94 = vector.extract_strided_slice %82 {offsets = [48, 0], sizes = [16, 32], strides = [1, 1]} : vector<64x32xf32> to vector<16x32xf32>
    %95 = vector.broadcast %34 : vector<1x32xf32> to vector<16x32xf32>
    %96 = arith.mulf %94, %95 : vector<16x32xf32>
    %97 = arith.addf %93, %96 : vector<16x32xf32>
    %98 = arith.truncf %97 : vector<16x32xf32> to vector<16x32xbf16>
    %c0_54 = arith.constant 0 : index
    %c0_55 = arith.constant 0 : index
    %c0_56 = arith.constant 0 : index
    %99 = vector.load %arg8[%c0_54, %c0_55, %c0_56] : memref<2x32x32xbf16, #tpu.memory_space<vmem>>, vector<1x32x32xbf16>
    %100 = vector.shape_cast %99 : vector<1x32x32xbf16> to vector<32x32xbf16>
    %cst_57 = arith.constant dense<0.000000e+00> : vector<16x32xf32>
    %101 = tpu.matmul %98, %100, %cst_57 {dimension_numbers = #tpu.dot_dimension_numbers<[1], [0], [0], [1], [0, 0, 1, 1], [], []>} : vector<16x32xbf16>, vector<32x32xbf16>, vector<16x32xf32> -> vector<16x32xf32>
    %c0_58 = arith.constant 0 : index
    %c0_59 = arith.constant 0 : index
    %c0_60 = arith.constant 0 : index
    %102 = vector.load %arg9[%c0_58, %c0_59, %c0_60] : memref<2x1x32xf32, #tpu.memory_space<vmem>>, vector<1x1x32xf32>
    %103 = vector.shape_cast %102 : vector<1x1x32xf32> to vector<1x32xf32>
    %104 = vector.broadcast %103 : vector<1x32xf32> to vector<16x32xf32>
    %105 = arith.addf %101, %104 : vector<16x32xf32>
    %106 = arith.addf %105, %26 : vector<16x32xf32>
    %c0_61 = arith.constant 0 : index
    %c0_62 = arith.constant 0 : index
    %c0_63 = arith.constant 0 : index
    %c0_64 = arith.constant 0 : index
    %107 = vector.load %arg10[%c0_61, %c0_62, %c0_63, %c0_64] : memref<2x2x1x32xf32, #tpu.memory_space<vmem>>, vector<1x1x1x32xf32>
    %108 = vector.shape_cast %107 : vector<1x1x1x32xf32> to vector<1x32xf32>
    %c0_65 = arith.constant 0 : index
    %c1_66 = arith.constant 1 : index
    %c0_67 = arith.constant 0 : index
    %c0_68 = arith.constant 0 : index
    %109 = vector.load %arg10[%c0_65, %c1_66, %c0_67, %c0_68] : memref<2x2x1x32xf32, #tpu.memory_space<vmem>>, vector<1x1x1x32xf32>
    %110 = vector.shape_cast %109 : vector<1x1x1x32xf32> to vector<1x32xf32>
    %cst_69 = arith.constant dense<0.000000e+00> : vector<16xf32>
    %111 = vector.multi_reduction <add>, %106, %cst_69 [1] : vector<16x32xf32> to vector<16xf32>
    %112 = vector.shape_cast %111 : vector<16xf32> to vector<16x1xf32>
    %cst_70 = arith.constant 3.200000e+01 : f32
    %113 = vector.broadcast %cst_70 : f32 to vector<16x1xf32>
    %114 = arith.divf %112, %113 : vector<16x1xf32>
    %115 = vector.broadcast %114 : vector<16x1xf32> to vector<16x32xf32>
    %116 = arith.subf %106, %115 : vector<16x32xf32>
    %117 = arith.mulf %116, %116 : vector<16x32xf32>
    %cst_71 = arith.constant dense<0.000000e+00> : vector<16xf32>
    %118 = vector.multi_reduction <add>, %117, %cst_71 [1] : vector<16x32xf32> to vector<16xf32>
    %119 = vector.shape_cast %118 : vector<16xf32> to vector<16x1xf32>
    %cst_72 = arith.constant 3.200000e+01 : f32
    %120 = vector.broadcast %cst_72 : f32 to vector<16x1xf32>
    %121 = arith.divf %119, %120 : vector<16x1xf32>
    %122 = vector.broadcast %114 : vector<16x1xf32> to vector<16x32xf32>
    %123 = arith.subf %106, %122 : vector<16x32xf32>
    %cst_73 = arith.constant 9.99999996E-13 : f32
    %124 = vector.broadcast %cst_73 : f32 to vector<16x1xf32>
    %125 = arith.addf %121, %124 : vector<16x1xf32>
    %126 = math.rsqrt %125 : vector<16x1xf32>
    %127 = vector.broadcast %126 : vector<16x1xf32> to vector<16x32xf32>
    %128 = arith.mulf %123, %127 : vector<16x32xf32>
    %129 = vector.broadcast %108 : vector<1x32xf32> to vector<16x32xf32>
    %130 = arith.mulf %128, %129 : vector<16x32xf32>
    %131 = vector.broadcast %110 : vector<1x32xf32> to vector<16x32xf32>
    %132 = arith.addf %130, %131 : vector<16x32xf32>
    %133 = arith.truncf %132 : vector<16x32xf32> to vector<16x32xbf16>
    %c0_74 = arith.constant 0 : index
    %c0_75 = arith.constant 0 : index
    %c0_76 = arith.constant 0 : index
    %134 = vector.load %arg11[%c0_74, %c0_75, %c0_76] : memref<2x32x64xbf16, #tpu.memory_space<vmem>>, vector<1x32x64xbf16>
    %135 = vector.shape_cast %134 : vector<1x32x64xbf16> to vector<32x64xbf16>
    %cst_77 = arith.constant dense<0.000000e+00> : vector<16x64xf32>
    %136 = tpu.matmul %133, %135, %cst_77 {dimension_numbers = #tpu.dot_dimension_numbers<[1], [0], [0], [1], [0, 0, 1, 1], [], []>} : vector<16x32xbf16>, vector<32x64xbf16>, vector<16x64xf32> -> vector<16x64xf32>
    %c0_78 = arith.constant 0 : index
    %c0_79 = arith.constant 0 : index
    %c0_80 = arith.constant 0 : index
    %137 = vector.load %arg12[%c0_78, %c0_79, %c0_80] : memref<2x1x64xf32, #tpu.memory_space<vmem>>, vector<1x1x64xf32>
    %138 = vector.shape_cast %137 : vector<1x1x64xf32> to vector<1x64xf32>
    %139 = vector.broadcast %138 : vector<1x64xf32> to vector<16x64xf32>
    %140 = arith.addf %136, %139 : vector<16x64xf32>
    %141 = arith.mulf %140, %140 : vector<16x64xf32>
    %142 = arith.mulf %140, %141 : vector<16x64xf32>
    %cst_81 = arith.constant 4.471500e-02 : f32
    %143 = vector.broadcast %cst_81 : f32 to vector<16x64xf32>
    %144 = arith.mulf %143, %142 : vector<16x64xf32>
    %145 = arith.addf %140, %144 : vector<16x64xf32>
    %cst_82 = arith.constant 0.797884583 : f32
    %146 = vector.broadcast %cst_82 : f32 to vector<16x64xf32>
    %147 = arith.mulf %146, %145 : vector<16x64xf32>
    %148 = math.tanh %147 : vector<16x64xf32>
    %cst_83 = arith.constant 1.000000e+00 : f32
    %149 = vector.broadcast %cst_83 : f32 to vector<16x64xf32>
    %150 = arith.addf %149, %148 : vector<16x64xf32>
    %cst_84 = arith.constant 5.000000e-01 : f32
    %151 = vector.broadcast %cst_84 : f32 to vector<16x64xf32>
    %152 = arith.mulf %151, %150 : vector<16x64xf32>
    %153 = arith.mulf %140, %152 : vector<16x64xf32>
    %154 = arith.truncf %153 : vector<16x64xf32> to vector<16x64xbf16>
    %c0_85 = arith.constant 0 : index
    %c0_86 = arith.constant 0 : index
    %c0_87 = arith.constant 0 : index
    %155 = vector.load %arg13[%c0_85, %c0_86, %c0_87] : memref<2x64x32xbf16, #tpu.memory_space<vmem>>, vector<1x64x32xbf16>
    %156 = vector.shape_cast %155 : vector<1x64x32xbf16> to vector<64x32xbf16>
    %cst_88 = arith.constant dense<0.000000e+00> : vector<16x32xf32>
    %157 = tpu.matmul %154, %156, %cst_88 {dimension_numbers = #tpu.dot_dimension_numbers<[1], [0], [0], [1], [0, 0, 1, 1], [], []>} : vector<16x64xbf16>, vector<64x32xbf16>, vector<16x32xf32> -> vector<16x32xf32>
    %c0_89 = arith.constant 0 : index
    %c0_90 = arith.constant 0 : index
    %c0_91 = arith.constant 0 : index
    %158 = vector.load %arg14[%c0_89, %c0_90, %c0_91] : memref<2x1x32xf32, #tpu.memory_space<vmem>>, vector<1x1x32xf32>
    %159 = vector.shape_cast %158 : vector<1x1x32xf32> to vector<1x32xf32>
    %160 = vector.broadcast %159 : vector<1x32xf32> to vector<16x32xf32>
    %161 = arith.addf %157, %160 : vector<16x32xf32>
    %162 = arith.addf %161, %132 : vector<16x32xf32>
    %c0_92 = arith.constant 0 : index
    %c0_93 = arith.constant 0 : index
    %c0_94 = arith.constant 0 : index
    %c0_95 = arith.constant 0 : index
    %163 = vector.load %arg15[%c0_92, %c0_93, %c0_94, %c0_95] : memref<2x2x1x32xf32, #tpu.memory_space<vmem>>, vector<1x1x1x32xf32>
    %164 = vector.shape_cast %163 : vector<1x1x1x32xf32> to vector<1x32xf32>
    %c0_96 = arith.constant 0 : index
    %c1_97 = arith.constant 1 : index
    %c0_98 = arith.constant 0 : index
    %c0_99 = arith.constant 0 : index
    %165 = vector.load %arg15[%c0_96, %c1_97, %c0_98, %c0_99] : memref<2x2x1x32xf32, #tpu.memory_space<vmem>>, vector<1x1x1x32xf32>
    %166 = vector.shape_cast %165 : vector<1x1x1x32xf32> to vector<1x32xf32>
    %cst_100 = arith.constant dense<0.000000e+00> : vector<16xf32>
    %167 = vector.multi_reduction <add>, %162, %cst_100 [1] : vector<16x32xf32> to vector<16xf32>
    %168 = vector.shape_cast %167 : vector<16xf32> to vector<16x1xf32>
    %cst_101 = arith.constant 3.200000e+01 : f32
    %169 = vector.broadcast %cst_101 : f32 to vector<16x1xf32>
    %170 = arith.divf %168, %169 : vector<16x1xf32>
    %171 = vector.broadcast %170 : vector<16x1xf32> to vector<16x32xf32>
    %172 = arith.subf %162, %171 : vector<16x32xf32>
    %173 = arith.mulf %172, %172 : vector<16x32xf32>
    %cst_102 = arith.constant dense<0.000000e+00> : vector<16xf32>
    %174 = vector.multi_reduction <add>, %173, %cst_102 [1] : vector<16x32xf32> to vector<16xf32>
    %175 = vector.shape_cast %174 : vector<16xf32> to vector<16x1xf32>
    %cst_103 = arith.constant 3.200000e+01 : f32
    %176 = vector.broadcast %cst_103 : f32 to vector<16x1xf32>
    %177 = arith.divf %175, %176 : vector<16x1xf32>
    %178 = vector.broadcast %170 : vector<16x1xf32> to vector<16x32xf32>
    %179 = arith.subf %162, %178 : vector<16x32xf32>
    %cst_104 = arith.constant 9.99999996E-13 : f32
    %180 = vector.broadcast %cst_104 : f32 to vector<16x1xf32>
    %181 = arith.addf %177, %180 : vector<16x1xf32>
    %182 = math.rsqrt %181 : vector<16x1xf32>
    %183 = vector.broadcast %182 : vector<16x1xf32> to vector<16x32xf32>
    %184 = arith.mulf %179, %183 : vector<16x32xf32>
    %185 = vector.broadcast %164 : vector<1x32xf32> to vector<16x32xf32>
    %186 = arith.mulf %184, %185 : vector<16x32xf32>
    %187 = vector.broadcast %166 : vector<1x32xf32> to vector<16x32xf32>
    %188 = arith.addf %186, %187 : vector<16x32xf32>
    %189 = arith.truncf %188 : vector<16x32xf32> to vector<16x32xbf16>
    %c1_105 = arith.constant 1 : index
    %c0_106 = arith.constant 0 : index
    %c0_107 = arith.constant 0 : index
    %c0_108 = arith.constant 0 : index
    %190 = vector.load %arg6[%c1_105, %c0_106, %c0_107, %c0_108] : memref<2x3x32x32xbf16, #tpu.memory_space<vmem>>, vector<1x1x32x32xbf16>
    %191 = vector.shape_cast %190 : vector<1x1x32x32xbf16> to vector<32x32xbf16>
    %cst_109 = arith.constant dense<0.000000e+00> : vector<16x32xf32>
    %192 = tpu.matmul %189, %191, %cst_109 {dimension_numbers = #tpu.dot_dimension_numbers<[1], [0], [0], [1], [0, 0, 1, 1], [], []>} : vector<16x32xbf16>, vector<32x32xbf16>, vector<16x32xf32> -> vector<16x32xf32>
    %c1_110 = arith.constant 1 : index
    %c0_111 = arith.constant 0 : index
    %c0_112 = arith.constant 0 : index
    %c0_113 = arith.constant 0 : index
    %193 = vector.load %arg7[%c1_110, %c0_111, %c0_112, %c0_113] : memref<2x3x1x32xf32, #tpu.memory_space<vmem>>, vector<1x1x1x32xf32>
    %194 = vector.shape_cast %193 : vector<1x1x1x32xf32> to vector<1x32xf32>
    %195 = vector.broadcast %194 : vector<1x32xf32> to vector<16x32xf32>
    %196 = arith.addf %192, %195 : vector<16x32xf32>
    %c1_114 = arith.constant 1 : index
    %c1_115 = arith.constant 1 : index
    %c0_116 = arith.constant 0 : index
    %c0_117 = arith.constant 0 : index
    %197 = vector.load %arg6[%c1_114, %c1_115, %c0_116, %c0_117] : memref<2x3x32x32xbf16, #tpu.memory_space<vmem>>, vector<1x1x32x32xbf16>
    %198 = vector.shape_cast %197 : vector<1x1x32x32xbf16> to vector<32x32xbf16>
    %cst_118 = arith.constant dense<0.000000e+00> : vector<16x32xf32>
    %199 = tpu.matmul %189, %198, %cst_118 {dimension_numbers = #tpu.dot_dimension_numbers<[1], [0], [0], [1], [0, 0, 1, 1], [], []>} : vector<16x32xbf16>, vector<32x32xbf16>, vector<16x32xf32> -> vector<16x32xf32>
    %c1_119 = arith.constant 1 : index
    %c1_120 = arith.constant 1 : index
    %c0_121 = arith.constant 0 : index
    %c0_122 = arith.constant 0 : index
    %200 = vector.load %arg7[%c1_119, %c1_120, %c0_121, %c0_122] : memref<2x3x1x32xf32, #tpu.memory_space<vmem>>, vector<1x1x1x32xf32>
    %201 = vector.shape_cast %200 : vector<1x1x1x32xf32> to vector<1x32xf32>
    %202 = vector.broadcast %201 : vector<1x32xf32> to vector<16x32xf32>
    %203 = arith.addf %199, %202 : vector<16x32xf32>
    %c1_123 = arith.constant 1 : index
    %c2_124 = arith.constant 2 : index
    %c0_125 = arith.constant 0 : index
    %c0_126 = arith.constant 0 : index
    %204 = vector.load %arg6[%c1_123, %c2_124, %c0_125, %c0_126] : memref<2x3x32x32xbf16, #tpu.memory_space<vmem>>, vector<1x1x32x32xbf16>
    %205 = vector.shape_cast %204 : vector<1x1x32x32xbf16> to vector<32x32xbf16>
    %cst_127 = arith.constant dense<0.000000e+00> : vector<16x32xf32>
    %206 = tpu.matmul %189, %205, %cst_127 {dimension_numbers = #tpu.dot_dimension_numbers<[1], [0], [0], [1], [0, 0, 1, 1], [], []>} : vector<16x32xbf16>, vector<32x32xbf16>, vector<16x32xf32> -> vector<16x32xf32>
    %c1_128 = arith.constant 1 : index
    %c2_129 = arith.constant 2 : index
    %c0_130 = arith.constant 0 : index
    %c0_131 = arith.constant 0 : index
    %207 = vector.load %arg7[%c1_128, %c2_129, %c0_130, %c0_131] : memref<2x3x1x32xf32, #tpu.memory_space<vmem>>, vector<1x1x1x32xf32>
    %208 = vector.shape_cast %207 : vector<1x1x1x32xf32> to vector<1x32xf32>
    %209 = vector.broadcast %208 : vector<1x32xf32> to vector<16x32xf32>
    %210 = arith.addf %206, %209 : vector<16x32xf32>
    %cst_132 = arith.constant 0.353553385 : f32
    %211 = vector.broadcast %cst_132 : f32 to vector<16x32xf32>
    %212 = arith.mulf %196, %211 : vector<16x32xf32>
    %213 = vector.broadcast %28 : vector<1x32xf32> to vector<16x32xf32>
    %214 = arith.mulf %212, %213 : vector<16x32xf32>
    %215 = vector.broadcast %30 : vector<1x32xf32> to vector<16x32xf32>
    %216 = arith.mulf %212, %215 : vector<16x32xf32>
    %217 = vector.broadcast %32 : vector<1x32xf32> to vector<16x32xf32>
    %218 = arith.mulf %212, %217 : vector<16x32xf32>
    %219 = vector.broadcast %34 : vector<1x32xf32> to vector<16x32xf32>
    %220 = arith.mulf %212, %219 : vector<16x32xf32>
    %221 = tpu.concatenate %214, %216, %218, %220 in 0 : vector<16x32xf32>, vector<16x32xf32>, vector<16x32xf32>, vector<16x32xf32> -> vector<64x32xf32>
    "tpu.trace_start"() <{level = 10 : i32, message = "qd,kd->qk"}> : () -> ()
    %cst_133 = arith.constant dense<0.000000e+00> : vector<64x16xf32>
    %222 = tpu.matmul %221, %203, %cst_133 {dimension_numbers = #tpu.dot_dimension_numbers<[1], [1], [0], [0], [0, 0, 1, 0], [], []>} : vector<64x32xf32>, vector<16x32xf32>, vector<64x16xf32> -> vector<64x16xf32>
    "tpu.trace_stop"() : () -> ()
    %223 = arith.addf %222, %36 : vector<64x16xf32>
    %cst_134 = arith.constant dense<0xFF800000> : vector<64xf32>
    %224 = vector.multi_reduction <maximumf>, %223, %cst_134 [1] : vector<64x16xf32> to vector<64xf32>
    %225 = vector.shape_cast %224 : vector<64xf32> to vector<64x1xf32>
    %226 = vector.broadcast %225 : vector<64x1xf32> to vector<64x16xf32>
    %227 = arith.subf %223, %226 : vector<64x16xf32>
    %228 = math.exp %227 : vector<64x16xf32>
    %cst_135 = arith.constant dense<0.000000e+00> : vector<64xf32>
    %229 = vector.multi_reduction <add>, %228, %cst_135 [1] : vector<64x16xf32> to vector<64xf32>
    %230 = vector.shape_cast %229 : vector<64xf32> to vector<64x1xf32>
    %231 = tpu.reciprocal %230 {approx = true} : vector<64x1xf32> -> vector<64x1xf32>
    %232 = vector.broadcast %231 : vector<64x1xf32> to vector<64x16xf32>
    %233 = arith.mulf %228, %232 : vector<64x16xf32>
    %cst_136 = arith.constant dense<0.000000e+00> : vector<64x32xf32>
    %234 = tpu.matmul %233, %210, %cst_136 {dimension_numbers = #tpu.dot_dimension_numbers<[1], [0], [0], [1], [0, 0, 1, 1], [], []>} : vector<64x16xf32>, vector<16x32xf32>, vector<64x32xf32> -> vector<64x32xf32>
    %235 = vector.extract_strided_slice %234 {offsets = [0, 0], sizes = [16, 32], strides = [1, 1]} : vector<64x32xf32> to vector<16x32xf32>
    %236 = vector.broadcast %28 : vector<1x32xf32> to vector<16x32xf32>
    %237 = arith.mulf %235, %236 : vector<16x32xf32>
    %238 = vector.extract_strided_slice %234 {offsets = [16, 0], sizes = [16, 32], strides = [1, 1]} : vector<64x32xf32> to vector<16x32xf32>
    %239 = vector.broadcast %30 : vector<1x32xf32> to vector<16x32xf32>
    %240 = arith.mulf %238, %239 : vector<16x32xf32>
    %241 = arith.addf %237, %240 : vector<16x32xf32>
    %242 = vector.extract_strided_slice %234 {offsets = [32, 0], sizes = [16, 32], strides = [1, 1]} : vector<64x32xf32> to vector<16x32xf32>
    %243 = vector.broadcast %32 : vector<1x32xf32> to vector<16x32xf32>
    %244 = arith.mulf %242, %243 : vector<16x32xf32>
    %245 = arith.addf %241, %244 : vector<16x32xf32>
    %246 = vector.extract_strided_slice %234 {offsets = [48, 0], sizes = [16, 32], strides = [1, 1]} : vector<64x32xf32> to vector<16x32xf32>
    %247 = vector.broadcast %34 : vector<1x32xf32> to vector<16x32xf32>
    %248 = arith.mulf %246, %247 : vector<16x32xf32>
    %249 = arith.addf %245, %248 : vector<16x32xf32>
    %250 = arith.truncf %249 : vector<16x32xf32> to vector<16x32xbf16>
    %c1_137 = arith.constant 1 : index
    %c0_138 = arith.constant 0 : index
    %c0_139 = arith.constant 0 : index
    %251 = vector.load %arg8[%c1_137, %c0_138, %c0_139] : memref<2x32x32xbf16, #tpu.memory_space<vmem>>, vector<1x32x32xbf16>
    %252 = vector.shape_cast %251 : vector<1x32x32xbf16> to vector<32x32xbf16>
    %cst_140 = arith.constant dense<0.000000e+00> : vector<16x32xf32>
    %253 = tpu.matmul %250, %252, %cst_140 {dimension_numbers = #tpu.dot_dimension_numbers<[1], [0], [0], [1], [0, 0, 1, 1], [], []>} : vector<16x32xbf16>, vector<32x32xbf16>, vector<16x32xf32> -> vector<16x32xf32>
    %c1_141 = arith.constant 1 : index
    %c0_142 = arith.constant 0 : index
    %c0_143 = arith.constant 0 : index
    %254 = vector.load %arg9[%c1_141, %c0_142, %c0_143] : memref<2x1x32xf32, #tpu.memory_space<vmem>>, vector<1x1x32xf32>
    %255 = vector.shape_cast %254 : vector<1x1x32xf32> to vector<1x32xf32>
    %256 = vector.broadcast %255 : vector<1x32xf32> to vector<16x32xf32>
    %257 = arith.addf %253, %256 : vector<16x32xf32>
    %258 = arith.addf %257, %188 : vector<16x32xf32>
    %c1_144 = arith.constant 1 : index
    %c0_145 = arith.constant 0 : index
    %c0_146 = arith.constant 0 : index
    %c0_147 = arith.constant 0 : index
    %259 = vector.load %arg10[%c1_144, %c0_145, %c0_146, %c0_147] : memref<2x2x1x32xf32, #tpu.memory_space<vmem>>, vector<1x1x1x32xf32>
    %260 = vector.shape_cast %259 : vector<1x1x1x32xf32> to vector<1x32xf32>
    %c1_148 = arith.constant 1 : index
    %c1_149 = arith.constant 1 : index
    %c0_150 = arith.constant 0 : index
    %c0_151 = arith.constant 0 : index
    %261 = vector.load %arg10[%c1_148, %c1_149, %c0_150, %c0_151] : memref<2x2x1x32xf32, #tpu.memory_space<vmem>>, vector<1x1x1x32xf32>
    %262 = vector.shape_cast %261 : vector<1x1x1x32xf32> to vector<1x32xf32>
    %cst_152 = arith.constant dense<0.000000e+00> : vector<16xf32>
    %263 = vector.multi_reduction <add>, %258, %cst_152 [1] : vector<16x32xf32> to vector<16xf32>
    %264 = vector.shape_cast %263 : vector<16xf32> to vector<16x1xf32>
    %cst_153 = arith.constant 3.200000e+01 : f32
    %265 = vector.broadcast %cst_153 : f32 to vector<16x1xf32>
    %266 = arith.divf %264, %265 : vector<16x1xf32>
    %267 = vector.broadcast %266 : vector<16x1xf32> to vector<16x32xf32>
    %268 = arith.subf %258, %267 : vector<16x32xf32>
    %269 = arith.mulf %268, %268 : vector<16x32xf32>
    %cst_154 = arith.constant dense<0.000000e+00> : vector<16xf32>
    %270 = vector.multi_reduction <add>, %269, %cst_154 [1] : vector<16x32xf32> to vector<16xf32>
    %271 = vector.shape_cast %270 : vector<16xf32> to vector<16x1xf32>
    %cst_155 = arith.constant 3.200000e+01 : f32
    %272 = vector.broadcast %cst_155 : f32 to vector<16x1xf32>
    %273 = arith.divf %271, %272 : vector<16x1xf32>
    %274 = vector.broadcast %266 : vector<16x1xf32> to vector<16x32xf32>
    %275 = arith.subf %258, %274 : vector<16x32xf32>
    %cst_156 = arith.constant 9.99999996E-13 : f32
    %276 = vector.broadcast %cst_156 : f32 to vector<16x1xf32>
    %277 = arith.addf %273, %276 : vector<16x1xf32>
    %278 = math.rsqrt %277 : vector<16x1xf32>
    %279 = vector.broadcast %278 : vector<16x1xf32> to vector<16x32xf32>
    %280 = arith.mulf %275, %279 : vector<16x32xf32>
    %281 = vector.broadcast %260 : vector<1x32xf32> to vector<16x32xf32>
    %282 = arith.mulf %280, %281 : vector<16x32xf32>
    %283 = vector.broadcast %262 : vector<1x32xf32> to vector<16x32xf32>
    %284 = arith.addf %282, %283 : vector<16x32xf32>
    %285 = arith.truncf %284 : vector<16x32xf32> to vector<16x32xbf16>
    %c1_157 = arith.constant 1 : index
    %c0_158 = arith.constant 0 : index
    %c0_159 = arith.constant 0 : index
    %286 = vector.load %arg11[%c1_157, %c0_158, %c0_159] : memref<2x32x64xbf16, #tpu.memory_space<vmem>>, vector<1x32x64xbf16>
    %287 = vector.shape_cast %286 : vector<1x32x64xbf16> to vector<32x64xbf16>
    %cst_160 = arith.constant dense<0.000000e+00> : vector<16x64xf32>
    %288 = tpu.matmul %285, %287, %cst_160 {dimension_numbers = #tpu.dot_dimension_numbers<[1], [0], [0], [1], [0, 0, 1, 1], [], []>} : vector<16x32xbf16>, vector<32x64xbf16>, vector<16x64xf32> -> vector<16x64xf32>
    %c1_161 = arith.constant 1 : index
    %c0_162 = arith.constant 0 : index
    %c0_163 = arith.constant 0 : index
    %289 = vector.load %arg12[%c1_161, %c0_162, %c0_163] : memref<2x1x64xf32, #tpu.memory_space<vmem>>, vector<1x1x64xf32>
    %290 = vector.shape_cast %289 : vector<1x1x64xf32> to vector<1x64xf32>
    %291 = vector.broadcast %290 : vector<1x64xf32> to vector<16x64xf32>
    %292 = arith.addf %288, %291 : vector<16x64xf32>
    %293 = arith.mulf %292, %292 : vector<16x64xf32>
    %294 = arith.mulf %292, %293 : vector<16x64xf32>
    %cst_164 = arith.constant 4.471500e-02 : f32
    %295 = vector.broadcast %cst_164 : f32 to vector<16x64xf32>
    %296 = arith.mulf %295, %294 : vector<16x64xf32>
    %297 = arith.addf %292, %296 : vector<16x64xf32>
    %cst_165 = arith.constant 0.797884583 : f32
    %298 = vector.broadcast %cst_165 : f32 to vector<16x64xf32>
    %299 = arith.mulf %298, %297 : vector<16x64xf32>
    %300 = math.tanh %299 : vector<16x64xf32>
    %cst_166 = arith.constant 1.000000e+00 : f32
    %301 = vector.broadcast %cst_166 : f32 to vector<16x64xf32>
    %302 = arith.addf %301, %300 : vector<16x64xf32>
    %cst_167 = arith.constant 5.000000e-01 : f32
    %303 = vector.broadcast %cst_167 : f32 to vector<16x64xf32>
    %304 = arith.mulf %303, %302 : vector<16x64xf32>
    %305 = arith.mulf %292, %304 : vector<16x64xf32>
    %306 = arith.truncf %305 : vector<16x64xf32> to vector<16x64xbf16>
    %c1_168 = arith.constant 1 : index
    %c0_169 = arith.constant 0 : index
    %c0_170 = arith.constant 0 : index
    %307 = vector.load %arg13[%c1_168, %c0_169, %c0_170] : memref<2x64x32xbf16, #tpu.memory_space<vmem>>, vector<1x64x32xbf16>
    %308 = vector.shape_cast %307 : vector<1x64x32xbf16> to vector<64x32xbf16>
    %cst_171 = arith.constant dense<0.000000e+00> : vector<16x32xf32>
    %309 = tpu.matmul %306, %308, %cst_171 {dimension_numbers = #tpu.dot_dimension_numbers<[1], [0], [0], [1], [0, 0, 1, 1], [], []>} : vector<16x64xbf16>, vector<64x32xbf16>, vector<16x32xf32> -> vector<16x32xf32>
    %c1_172 = arith.constant 1 : index
    %c0_173 = arith.constant 0 : index
    %c0_174 = arith.constant 0 : index
    %310 = vector.load %arg14[%c1_172, %c0_173, %c0_174] : memref<2x1x32xf32, #tpu.memory_space<vmem>>, vector<1x1x32xf32>
    %311 = vector.shape_cast %310 : vector<1x1x32xf32> to vector<1x32xf32>
    %312 = vector.broadcast %311 : vector<1x32xf32> to vector<16x32xf32>
    %313 = arith.addf %309, %312 : vector<16x32xf32>
    %314 = arith.addf %313, %284 : vector<16x32xf32>
    %c1_175 = arith.constant 1 : index
    %c0_176 = arith.constant 0 : index
    %c0_177 = arith.constant 0 : index
    %c0_178 = arith.constant 0 : index
    %315 = vector.load %arg15[%c1_175, %c0_176, %c0_177, %c0_178] : memref<2x2x1x32xf32, #tpu.memory_space<vmem>>, vector<1x1x1x32xf32>
    %316 = vector.shape_cast %315 : vector<1x1x1x32xf32> to vector<1x32xf32>
    %c1_179 = arith.constant 1 : index
    %c1_180 = arith.constant 1 : index
    %c0_181 = arith.constant 0 : index
    %c0_182 = arith.constant 0 : index
    %317 = vector.load %arg15[%c1_179, %c1_180, %c0_181, %c0_182] : memref<2x2x1x32xf32, #tpu.memory_space<vmem>>, vector<1x1x1x32xf32>
    %318 = vector.shape_cast %317 : vector<1x1x1x32xf32> to vector<1x32xf32>
    %cst_183 = arith.constant dense<0.000000e+00> : vector<16xf32>
    %319 = vector.multi_reduction <add>, %314, %cst_183 [1] : vector<16x32xf32> to vector<16xf32>
    %320 = vector.shape_cast %319 : vector<16xf32> to vector<16x1xf32>
    %cst_184 = arith.constant 3.200000e+01 : f32
    %321 = vector.broadcast %cst_184 : f32 to vector<16x1xf32>
    %322 = arith.divf %320, %321 : vector<16x1xf32>
    %323 = vector.broadcast %322 : vector<16x1xf32> to vector<16x32xf32>
    %324 = arith.subf %314, %323 : vector<16x32xf32>
    %325 = arith.mulf %324, %324 : vector<16x32xf32>
    %cst_185 = arith.constant dense<0.000000e+00> : vector<16xf32>
    %326 = vector.multi_reduction <add>, %325, %cst_185 [1] : vector<16x32xf32> to vector<16xf32>
    %327 = vector.shape_cast %326 : vector<16xf32> to vector<16x1xf32>
    %cst_186 = arith.constant 3.200000e+01 : f32
    %328 = vector.broadcast %cst_186 : f32 to vector<16x1xf32>
    %329 = arith.divf %327, %328 : vector<16x1xf32>
    %330 = vector.broadcast %322 : vector<16x1xf32> to vector<16x32xf32>
    %331 = arith.subf %314, %330 : vector<16x32xf32>
    %cst_187 = arith.constant 9.99999996E-13 : f32
    %332 = vector.broadcast %cst_187 : f32 to vector<16x1xf32>
    %333 = arith.addf %329, %332 : vector<16x1xf32>
    %334 = math.rsqrt %333 : vector<16x1xf32>
    %335 = vector.broadcast %334 : vector<16x1xf32> to vector<16x32xf32>
    %336 = arith.mulf %331, %335 : vector<16x32xf32>
    %337 = vector.broadcast %316 : vector<1x32xf32> to vector<16x32xf32>
    %338 = arith.mulf %336, %337 : vector<16x32xf32>
    %339 = vector.broadcast %318 : vector<1x32xf32> to vector<16x32xf32>
    %340 = arith.addf %338, %339 : vector<16x32xf32>
    %c0_188 = arith.constant 0 : index
    %c0_189 = arith.constant 0 : index
    %341 = vector.load %arg3[%c0_188, %c0_189] : memref<2x16xf32, #tpu.memory_space<vmem>>, vector<2x16xf32>
    %cst_190 = arith.constant dense<0.000000e+00> : vector<2x32xf32>
    %342 = tpu.matmul %341, %340, %cst_190 {dimension_numbers = #tpu.dot_dimension_numbers<[1], [0], [0], [1], [0, 0, 1, 1], [], []>} : vector<2x16xf32>, vector<16x32xf32>, vector<2x32xf32> -> vector<2x32xf32>
    %c0_191 = arith.constant 0 : index
    %c0_192 = arith.constant 0 : index
    %343 = vector.load %arg18[%c0_191, %c0_192] : memref<2x32xf32, #tpu.memory_space<vmem>>, vector<2x32xf32>
    tpu.vector_store %arg18[%c0_191, %c0_192], %342 {strides = array<i32>} : memref<2x32xf32, #tpu.memory_space<vmem>>, vector<2x32xf32>,
    return
  }
  func.func @transform_0(%arg0: i32) -> (i32, i32) {
    %c0_i32 = arith.constant 0 : i32
    %c0_i32_0 = arith.constant 0 : i32
    %c0_i32_1 = arith.constant 0 : i32
    return %c0_i32, %c0_i32_0 : i32, i32
  }
  func.func @transform_1(%arg0: i32) -> (i32, i32) {
    %c0_i32 = arith.constant 0 : i32
    %c0_i32_0 = arith.constant 0 : i32
    %c0_i32_1 = arith.constant 0 : i32
    return %c0_i32, %c0_i32_0 : i32, i32
  }
  func.func @transform_2(%arg0: i32) -> (i32, i32) {
    %c0_i32 = arith.constant 0 : i32
    %c0_i32_0 = arith.constant 0 : i32
    %c0_i32_1 = arith.constant 0 : i32
    return %c0_i32, %c0_i32_0 : i32, i32
  }
  func.func @transform_3(%arg0: i32) -> (i32, i32, i32) {
    %c0_i32 = arith.constant 0 : i32
    %c0_i32_0 = arith.constant 0 : i32
    %c0_i32_1 = arith.constant 0 : i32
    %c0_i32_2 = arith.constant 0 : i32
    return %c0_i32, %c0_i32_0, %c0_i32_1 : i32, i32, i32
  }
  func.func @transform_4(%arg0: i32) -> (i32, i32, i32) {
    %c0_i32 = arith.constant 0 : i32
    %c0_i32_0 = arith.constant 0 : i32
    %c0_i32_1 = arith.constant 0 : i32
    %c0_i32_2 = arith.constant 0 : i32
    return %c0_i32, %c0_i32_0, %c0_i32_1 : i32, i32, i32
  }
  func.func @transform_5(%arg0: i32) -> (i32, i32, i32, i32) {
    %c0_i32 = arith.constant 0 : i32
    %c0_i32_0 = arith.constant 0 : i32
    %c0_i32_1 = arith.constant 0 : i32
    %c0_i32_2 = arith.constant 0 : i32
    %c0_i32_3 = arith.constant 0 : i32
    return %c0_i32, %c0_i32_0, %c0_i32_1, %c0_i32_2 : i32, i32, i32, i32
  }
  func.func @transform_6(%arg0: i32) -> (i32, i32, i32, i32) {
    %c0_i32 = arith.constant 0 : i32
    %c0_i32_0 = arith.constant 0 : i32
    %c0_i32_1 = arith.constant 0 : i32
    %c0_i32_2 = arith.constant 0 : i32
    %c0_i32_3 = arith.constant 0 : i32
    return %c0_i32, %c0_i32_0, %c0_i32_1, %c0_i32_2 : i32, i32, i32, i32
  }
  func.func @transform_7(%arg0: i32) -> (i32, i32, i32) {
    %c0_i32 = arith.constant 0 : i32
    %c0_i32_0 = arith.constant 0 : i32
    %c0_i32_1 = arith.constant 0 : i32
    %c0_i32_2 = arith.constant 0 : i32
    return %c0_i32, %c0_i32_0, %c0_i32_1 : i32, i32, i32
  }
  func.func @transform_8(%arg0: i32) -> (i32, i32, i32) {
    %c0_i32 = arith.constant 0 : i32
    %c0_i32_0 = arith.constant 0 : i32
    %c0_i32_1 = arith.constant 0 : i32
    %c0_i32_2 = arith.constant 0 : i32
    return %c0_i32, %c0_i32_0, %c0_i32_1 : i32, i32, i32
  }
  func.func @transform_9(%arg0: i32) -> (i32, i32, i32, i32) {
    %c0_i32 = arith.constant 0 : i32
    %c0_i32_0 = arith.constant 0 : i32
    %c0_i32_1 = arith.constant 0 : i32
    %c0_i32_2 = arith.constant 0 : i32
    %c0_i32_3 = arith.constant 0 : i32
    return %c0_i32, %c0_i32_0, %c0_i32_1, %c0_i32_2 : i32, i32, i32, i32
  }
  func.func @transform_10(%arg0: i32) -> (i32, i32, i32) {
    %c0_i32 = arith.constant 0 : i32
    %c0_i32_0 = arith.constant 0 : i32
    %c0_i32_1 = arith.constant 0 : i32
    %c0_i32_2 = arith.constant 0 : i32
    return %c0_i32, %c0_i32_0, %c0_i32_1 : i32, i32, i32
  }
  func.func @transform_11(%arg0: i32) -> (i32, i32, i32) {
    %c0_i32 = arith.constant 0 : i32
    %c0_i32_0 = arith.constant 0 : i32
    %c0_i32_1 = arith.constant 0 : i32
    %c0_i32_2 = arith.constant 0 : i32
    return %c0_i32, %c0_i32_0, %c0_i32_1 : i32, i32, i32
  }
  func.func @transform_12(%arg0: i32) -> (i32, i32, i32) {
    %c0_i32 = arith.constant 0 : i32
    %c0_i32_0 = arith.constant 0 : i32
    %c0_i32_1 = arith.constant 0 : i32
    %c0_i32_2 = arith.constant 0 : i32
    return %c0_i32, %c0_i32_0, %c0_i32_1 : i32, i32, i32
  }
  func.func @transform_13(%arg0: i32) -> (i32, i32, i32) {
    %c0_i32 = arith.constant 0 : i32
    %c0_i32_0 = arith.constant 0 : i32
    %c0_i32_1 = arith.constant 0 : i32
    %c0_i32_2 = arith.constant 0 : i32
    return %c0_i32, %c0_i32_0, %c0_i32_1 : i32, i32, i32
  }
  func.func @transform_14(%arg0: i32) -> (i32, i32, i32, i32) {
    %c0_i32 = arith.constant 0 : i32
    %c0_i32_0 = arith.constant 0 : i32
    %c0_i32_1 = arith.constant 0 : i32
    %c0_i32_2 = arith.constant 0 : i32
    %c0_i32_3 = arith.constant 0 : i32
    return %c0_i32, %c0_i32_0, %c0_i32_1, %c0_i32_2 : i32, i32, i32, i32
  }
  func.func @transform_15(%arg0: i32) -> (i32, i32) {
    %c0_i32 = arith.constant 0 : i32
    %c0_i32_0 = arith.constant 0 : i32
    %c0_i32_1 = arith.constant 0 : i32
    return %c0_i32, %c0_i32_0 : i32, i32
  }
  func.func @transform_16(%arg0: i32) -> (i32, i32) {
    %c0_i32 = arith.constant 0 : i32
    %c0_i32_0 = arith.constant 0 : i32
    %c0_i32_1 = arith.constant 0 : i32
    return %c0_i32, %c0_i32_0 : i32, i32
  }
  func.func @transform_17(%arg0: i32) -> (i32, i32) {
    %c0_i32 = arith.constant 0 : i32
    %c0_i32_0 = arith.constant 0 : i32
    %c0_i32_1 = arith.constant 0 : i32
    return %c0_i32, %c0_i32_0 : i32, i32
  }
}

</mosaic_0001>

<bundles_post_ra>
// kernel: bert_forward.1
= control target key start
LH: loop header
LB: loop body
LE: loop exit
PB: predicated region body
PF: predicated region fallthrough
CT: control target
= control target key end

     0   :  { %s2318_s0 = inlined_call_operand.vmem [shape: f32[16,32], index: 0, kind: input, shape index: {}]   ;;  %s2319_s1 = inlined_call_operand.vmem [shape: f32[16,16], index: 1, kind: input, shape index: {}]   ;;  %s2320_s2 = inlined_call_operand.vmem [shape: f32[2,16], index: 2, kind: input, shape index: {}]   ;;  %s2321_s3 = inlined_call_operand.vmem [shape: f32[4,1,32], index: 3, kind: input, shape index: {}]   ;;  %s2322_s4 = inlined_call_operand.vmem [shape: f32[2,1,32], index: 4, kind: input, shape index: {}]   ;;  %s2323_s5 = inlined_call_operand.vmem [shape: bf16[2,3,32,32], index: 5, kind: input, shape index: {}]   ;;  %s2324_s6 = inlined_call_operand.vmem [shape: f32[2,3,1,32], index: 6, kind: input, shape index: {}]   ;;  %s2325_s7 = inlined_call_operand.vmem [shape: bf16[2,32,32], index: 7, kind: input, shape index: {}]   ;;  %s2326_s8 = inlined_call_operand.vmem [shape: f32[2,1,32], index: 8, kind: input, shape index: {}]   ;;  %s2327_s9 = inlined_call_operand.vmem [shape: f32[2,2,1,32], index: 9, kind: input, shape index: {}]   ;;  %s2328_s10 = inlined_call_operand.vmem [shape: bf16[2,32,64], index: 10, kind: input, shape index: {}]   ;;  %s2329_s11 = inlined_call_operand.vmem [shape: f32[2,1,64], index: 11, kind: input, shape index: {}]   ;;  %s2330_s12 = inlined_call_operand.vmem [shape: bf16[2,64,32], index: 12, kind: input, shape index: {}]   ;;  %s2331_s13 = inlined_call_operand.vmem [shape: f32[2,1,32], index: 13, kind: input, shape index: {}]   ;;  %s2332_s14 = inlined_call_operand.vmem [shape: f32[2,2,1,32], index: 14, kind: input, shape index: {}]   ;;  %s2333_s15 = inlined_call_operand.vmem [shape: bf16[32,32], index: 15, kind: input, shape index: {}]   ;;  %s2334_s16 = inlined_call_operand.vmem [shape: f32[1,32], index: 16, kind: input, shape index: {}]   ;;  %s2335_s17 = inlined_call_operand.hbm [shape: f32[2,32], index: 17, kind: output, shape index: {}]  }
   0x1   :  { %2338 = sst [smem:[#allocation5_spill]] %s2318_s0 }
   0x2   :  { %2339 = sst [smem:[#allocation6_spill]] %s2319_s1 }
   0x3   :  { %s2340_s26 = sld [smem:[#allocation5_spill]]  ;;  %vm63_vm0 = vcmask 261120  }
   0x9   :  { %v58_v0 = vld [vmem:[%s2340_s26] sm:$0xff]  ;;  %v59_v1 = vld [vmem:[%s2340_s26 + $0x8] sm:$0xff] }
   0xa   :  { %v64_v2 = vsel %vm63_vm0, %v58_v0, 0.0  ;;  %v67_v3 = vsel %vm63_vm0, %v59_v1, 0.0 }
   0xb   :  { %65 = vadd.xlane.f32.xlu0 %v64_v2 }
  0x13   :  { %68 = vadd.xlane.f32.xlu0 %v67_v3 }
  0x14   :  { %22 = vsyncpa [#allocation3], 0  ;;  %v1843_v4 = vmov 32.0   ;;  %v1664_v21 = vld [vmem:[%s2323_s5 + $0x8] sm:$0xff]  ;;  %v1666_v22 = vld [vmem:[%s2323_s5 + $0x18] sm:$0xff]  ;;  %s2341_s26 = sld [smem:[#allocation6_spill]] }
  0x15   :  { %1719 = vrcp.f32 %v1843_v4  ;;  %164 = vmatpush.bf16.msra.mxu0 %v1664_v21  ;;  %200 = vmatpush.bf16.msra.mxu3 %v1666_v22  ;;  %v1663_v24 = vld [vmem:[%s2323_s5] sm:$0xff]  ;;  %v1665_v25 = vld [vmem:[%s2323_s5 + $0x10] sm:$0xff]  ;;  %v1668_v28 = vld [vmem:[%s2323_s5 + $0x28] sm:$0xff]  ;;  %vm337_vm8 = vcmask 130048   ;;  %vm695_vm15 = vcmask 523264   ;;  %s1844_s16 = smov [#allocation2]  }
  0x16   :  { %v1667_v31 = vld [vmem:[%s2323_s5 + $0x20] sm:$0xff]  ;;  %s1437_s29 = sshll.u32 %s1844_s16, 4  ;;  %s1438_s29 = int_to_ptr.vmem [resolvable:$true] %s1437_s29 }
  0x17   :  { %v1693_v46 = vld [vmem:[%s2322_s4] ss:$0 sm:$0xff]  ;;  %v1694_v51 = vld [vmem:[%s2322_s4 + $0x1] ss:$0 sm:$0xff] }
  0x18   :  { %v1695_v59 = vld [vmem:[%s2324_s6] ss:$0 sm:$0xff]  ;;  %v1696_v60 = vld [vmem:[%s2324_s6 + $0x1] ss:$0 sm:$0xff] }
  0x19   :  { %165 = vmatpush.bf16.msra.mxu0 %v1663_v24  ;;  %201 = vmatpush.bf16.msra.mxu3 %v1665_v25  ;;  %v1994_v2 = vld [vmem:[%s2321_s3] ss:$0 sm:$0xff] }
  0x1a   :  { %v2034_v22 = vld [vmem:[%s2341_s26] sm:$0xff] }
  0x1b   :  { %v1720_v5 = vpop.eup %1719 }
  0x1c   :  { %v71_v6 = vmul.f32 32.0, %v1720_v5  ;;  %vm75_vm1 = vweird.f32 %v1720_v5 }
  0x1d   :  { %236 = vmatpush.bf16.msrb.mxu0 %v1668_v28 }
  0x1e   :  { %v72_v7 = vsub.f32 1.0, %v71_v6  ;;  %v1697_v6 = vld [vmem:[%s2324_s6 + $0x2] ss:$0 sm:$0xff] }
  0x20   :  { %v73_v8 = vmul.f32 %v1720_v5, %v72_v7 }
  0x21   :  { %237 = vmatpush.bf16.msrb.mxu0 %v1667_v31 }
  0x22   :  { %v74_v9 = vadd.f32 %v1720_v5, %v73_v8 }
  0x24   :  { %v1943_v10 = vsel %vm75_vm1, %v1720_v5, %v74_v9 }
  0x7e   :  { %v66_v11 = vpop.xlane.xlu0 %65 }
  0x7f   :  { %v77_v12 = vmul.f32 %v1943_v10, %v66_v11 }
  0x81   :  { %v79_v13 = vsub.f32 %v58_v0, %v77_v12 }
  0x83   :  { %v81_v14 = vmul.f32 %v79_v13, %v79_v13 }
  0x85   :  { %v83_v15 = vsel %vm63_vm0, %v81_v14, 0.0 }
  0x86   :  { %84 = vadd.xlane.f32.xlu1 %v83_v15  ;;  %v69_v16 = vpop.xlane.xlu0 %68 }
  0x87   :  { %v78_v17 = vmul.f32 %v1943_v10, %v69_v16  ;;  %v2016_v16 = vld [vmem:[%s2321_s3 + $0x2] ss:$0 sm:$0xff] }
  0x89   :  { %v80_v18 = vsub.f32 %v59_v1, %v78_v17 }
  0x8b   :  { %v82_v19 = vmul.f32 %v80_v18, %v80_v18 }
  0x8d   :  { %v86_v20 = vsel %vm63_vm0, %v82_v19, 0.0  ;;  %v2025_v19 = vld [vmem:[%s2321_s3 + $0x3] ss:$0 sm:$0xff] }
  0x8e   :  { %87 = vadd.xlane.f32.xlu1 %v86_v20 }
  0xf9   :  { %v85_v23 = vpop.xlane.xlu1 %84 }
  0xfa   :  { %v89_v26 = vmul.f32 %v85_v23, %v1943_v10 }
  0xfc   :  { %v91_v27 = vadd.f32 1e-12, %v89_v26  ;;  %v2041_v26 = vld [vmem:[%s2341_s26 + $0x8] sm:$0xff] }
  0xfe   :  { %1721 = vrsqrt.f32 %v91_v27  ;;  %vm99_vm3 = vweird.f32 %v91_v27 }
 0x101   :  { %v88_v29 = vpop.xlane.xlu1 %87 }
 0x102   :  { %v90_v30 = vmul.f32 %v88_v29, %v1943_v10 }
 0x104   :  { %v1722_v32 = vpop.eup %1721  ;;  %v92_v33 = vadd.f32 1e-12, %v90_v30 }
 0x105   :  { %v94_v34 = vmul.f32 %v1722_v32, %v91_v27  ;;  %vm100_vm2 = vweird.f32 %v1722_v32 }
 0x106   :  { %1723 = vrsqrt.f32 %v92_v33  ;;  %vm101_vm4 = vmor %vm99_vm3, %vm100_vm2  ;;  %vm109_vm6 = vweird.f32 %v92_v33 }
 0x107   :  { %v95_v35 = vmul.f32 %v1722_v32, %v94_v34 }
 0x109   :  { %v96_v36 = vmul.f32 0.5, %v95_v35 }
 0x10b   :  { %v97_v37 = vsub.f32 1.5, %v96_v36 }
 0x10c   :  { %v1724_v38 = vpop.eup %1723 }
 0x10d   :  { %v98_v39 = vmul.f32 %v1722_v32, %v97_v37  ;;  %v104_v40 = vmul.f32 %v1724_v38, %v92_v33  ;;  %vm110_vm5 = vweird.f32 %v1724_v38 }
 0x10e   :  { %vm111_vm7 = vmor %vm109_vm6, %vm110_vm5 }
 0x10f   :  { %v105_v41 = vmul.f32 %v1724_v38, %v104_v40  ;;  %v102_v42 = vsel %vm101_vm4, %v1722_v32, %v98_v39 }
 0x110   :  { %v113_v45 = vmul.f32 %v102_v42, %v79_v13  ;;  %v2007_v13 = vld [vmem:[%s2321_s3 + $0x1] ss:$0 sm:$0xff] }
 0x111   :  { %v106_v43 = vmul.f32 0.5, %v105_v41 }
 0x112   :  { %v118_v50 = vmul.f32 %v1693_v46, %v113_v45 }
 0x113   :  { %v107_v44 = vsub.f32 1.5, %v106_v43 }
 0x114   :  { %v1975_v53 = vadd.f32 %v1694_v51, %v118_v50 }
 0x115   :  { %v108_v47 = vmul.f32 %v1724_v38, %v107_v44 }
 0x117   :  { %v112_v48 = vsel %vm111_vm7, %v1724_v38, %v108_v47 }
 0x118   :  { %v114_v49 = vmul.f32 %v112_v48, %v80_v18 }
 0x11a   :  { %v119_v52 = vmul.f32 %v1693_v46, %v114_v49 }
 0x11c   :  { %v1977_v54 = vadd.f32 %v1694_v51, %v119_v52 }
 0x11e   :  { %v134_v55 = vpack.c.bf16 %v1977_v54, %v1975_v53 }
 0x120   :  { %1460 = vmatmul.msk.bf16.vlgmr.msra.gmra.mxu0 %vm63_vm0, %v134_v55  ;;  %1474 = vmatmul.msk.bf16.vlgmr.msra.gmra.mxu3 %vm63_vm0, %v134_v55 }
 0x130   :  { %1488 = vmatmul.msk.bf16.vlgmr.msrb.gmra.mxu0 %vm63_vm0, %v134_v55 }
 0x19d   :  { %v167_v56 = vpop.f32.mrf.mxu0 }
 0x19e   :  { %v168_v61 = vadd.f32 %v1695_v59, %v167_v56 }
 0x1a0   :  { %v244_v1 = vmul.f32 0.35355338, %v168_v61 }
 0x1a2   :  { %v249_v5 = vmul.f32 %v1994_v2, %v244_v1  ;;  %v254_v14 = vmul.f32 %v2007_v13, %v244_v1  ;;  %v259_v17 = vmul.f32 %v2016_v16, %v244_v1  ;;  %v264_v20 = vmul.f32 %v2025_v19, %v244_v1 }
 0x1a3   :  { %v203_v57 = vpop.f32.mrf.mxu3 }
 0x1a4   :  { %v204_v3 = vadd.f32 %v1696_v60, %v203_v57 }
 0x1a5   :  { %v169_v58 = vpop.f32.mrf.mxu0 }
 0x1a6   :  { %v170_v4 = vadd.f32 %v1695_v59, %v169_v58 }
 0x1a8   :  { %v245_v9 = vmul.f32 0.35355338, %v170_v4 }
 0x1aa   :  { %v250_v12 = vmul.f32 %v1994_v2, %v245_v9  ;;  %v255_v15 = vmul.f32 %v2007_v13, %v245_v9  ;;  %v260_v18 = vmul.f32 %v2016_v16, %v245_v9  ;;  %v265_v21 = vmul.f32 %v2025_v19, %v245_v9 }
 0x1ab   :  { %v205_v62 = vpop.f32.mrf.mxu3 }
 0x1ac   :  { %v206_v63 = vadd.f32 %v1696_v60, %v205_v62 }
 0x1ad   :  { %v239_v0 = vpop.f32.mrf.mxu0 }
 0x1ae   :  { %1489 = vmatpush.xpose.msk.msrb.mxu3 %vm63_vm0, %v206_v63  ;;  %v240_v11 = vadd.f32 %v1697_v6, %v239_v0 }
 0x1b2   :  { %1490 = vmatpush.xpose.msk.msrb.mxu3 %vm63_vm0, %v204_v3 }
 0x1b5   :  { %v241_v7 = vpop.f32.mrf.mxu0  ;;  %1491 = vmatmul.msk.f32.vlgmr.msrb.gmra.mxu3 %vm63_vm0, %v249_v5 }
 0x1b6   :  { %v242_v8 = vadd.f32 %v1697_v6, %v241_v7 }
 0x1b8   :  { %464 = vmatpush.msra.mxu0 %v242_v8 }
 0x1ba   :  { %465 = vmatpush.msra.mxu0 %v240_v11 }
 0x1bd   :  { %1492 = vmatmul.msk.f32.gmra.mxu3 %vm63_vm0, %v250_v12 }
 0x1c5   :  { %1493 = vmatmul.msk.f32.gmra.mxu3 %vm63_vm0, %v254_v14 }
 0x1cd   :  { %1494 = vmatmul.msk.f32.gmra.mxu3 %vm63_vm0, %v255_v15 }
 0x1d5   :  { %1495 = vmatmul.msk.f32.gmra.mxu3 %vm63_vm0, %v259_v17 }
 0x1dd   :  { %1496 = vmatmul.msk.f32.gmra.mxu3 %vm63_vm0, %v260_v18 }
 0x1e5   :  { %1497 = vmatmul.msk.f32.gmra.mxu3 %vm63_vm0, %v264_v20 }
 0x1ed   :  { %1498 = vmatmul.msk.f32.gmra.mxu3 %vm63_vm0, %v265_v21 }
 0x238   :  { %v313_v23 = vpop.f32.mrf.mxu3 }
 0x239   :  { %v314_v24 = vadd.f32 %v313_v23, %v2034_v22 }
 0x23b   :  { %v338_v25 = vsel %vm337_vm8, %v314_v24, -inf }
 0x23c   :  { %339 = vmax.xlane.f32.xlu2 %v338_v25 }
 0x240   :  { %v316_v27 = vpop.f32.mrf.mxu3 }
 0x241   :  { %v317_v28 = vadd.f32 %v316_v27, %v2041_v26 }
 0x243   :  { %v341_v29 = vsel %vm337_vm8, %v317_v28, -inf }
 0x244   :  { %342 = vmax.xlane.f32.xlu2 %v341_v29 }
 0x248   :  { %v319_v30 = vpop.f32.mrf.mxu3 }
 0x249   :  { %v320_v31 = vadd.f32 %v319_v30, %v2034_v22 }
 0x24b   :  { %v344_v32 = vsel %vm337_vm8, %v320_v31, -inf }
 0x24c   :  { %345 = vmax.xlane.f32.xlu0 %v344_v32 }
 0x250   :  { %v322_v33 = vpop.f32.mrf.mxu3 }
 0x251   :  { %v323_v34 = vadd.f32 %v322_v33, %v2041_v26 }
 0x253   :  { %v347_v35 = vsel %vm337_vm8, %v323_v34, -inf }
 0x254   :  { %348 = vmax.xlane.f32.xlu1 %v347_v35 }
 0x258   :  { %v325_v36 = vpop.f32.mrf.mxu3 }
 0x259   :  { %v326_v37 = vadd.f32 %v325_v36, %v2034_v22 }
 0x25b   :  { %v350_v38 = vsel %vm337_vm8, %v326_v37, -inf }
 0x25c   :  { %351 = vmax.xlane.f32.xlu2 %v350_v38 }
 0x260   :  { %v328_v39 = vpop.f32.mrf.mxu3 }
 0x261   :  { %v329_v40 = vadd.f32 %v328_v39, %v2041_v26 }
 0x263   :  { %v353_v41 = vsel %vm337_vm8, %v329_v40, -inf }
 0x264   :  { %354 = vmax.xlane.f32.xlu0 %v353_v41 }
 0x268   :  { %v331_v42 = vpop.f32.mrf.mxu3 }
 0x269   :  { %v332_v43 = vadd.f32 %v331_v42, %v2034_v22 }
 0x26b   :  { %v356_v44 = vsel %vm337_vm8, %v332_v43, -inf }
 0x26c   :  { %357 = vmax.xlane.f32.xlu1 %v356_v44 }
 0x270   :  { %v334_v45 = vpop.f32.mrf.mxu3 }
 0x271   :  { %v335_v46 = vadd.f32 %v334_v45, %v2041_v26 }
 0x273   :  { %v359_v47 = vsel %vm337_vm8, %v335_v46, -inf }
 0x274   :  { %360 = vmax.xlane.f32.xlu0 %v359_v47 }
 0x2af   :  { %v340_v48 = vpop.xlane.xlu2 %339 }
 0x2b0   :  { %v362_v49 = vsub.f32 %v314_v24, %v340_v48 }
 0x2b2   :  { %v370_v50 = vmul.f32 1.442695, %v362_v49 }
 0x2b4   :  { %1725 = vpow2.f32 %v370_v50 }
 0x2b7   :  { %v343_v51 = vpop.xlane.xlu2 %342 }
 0x2b8   :  { %v363_v52 = vsub.f32 %v317_v28, %v343_v51 }
 0x2ba   :  { %v1726_v55 = vpop.eup %1725  ;;  %v372_v56 = vmul.f32 1.442695, %v363_v52 }
 0x2bb   :  { %v386_v57 = vsel %vm337_vm8, %v1726_v55, 0.0 }
 0x2bc   :  { %1727 = vpow2.f32 %v372_v56  ;;  %387 = vadd.xlane.f32.xlu2 %v386_v57 }
 0x2bf   :  { %v346_v58 = vpop.xlane.xlu0 %345 }
 0x2c0   :  { %v364_v59 = vsub.f32 %v320_v31, %v346_v58 }
 0x2c2   :  { %v1728_v60 = vpop.eup %1727  ;;  %v374_v61 = vmul.f32 1.442695, %v364_v59 }
 0x2c3   :  { %v389_v62 = vsel %vm337_vm8, %v1728_v60, 0.0 }
 0x2c4   :  { %1729 = vpow2.f32 %v374_v61  ;;  %390 = vadd.xlane.f32.xlu1 %v389_v62  ;;  %v1670_v62 = vld [vmem:[%s2325_s7 + $0x8] sm:$0xff] }
 0x2c5   :  { %535 = vmatpush.bf16.msra.mxu1 %v1670_v62 }
 0x2c7   :  { %v349_v63 = vpop.xlane.xlu1 %348 }
 0x2c8   :  { %v365_v0 = vsub.f32 %v323_v34, %v349_v63 }
 0x2ca   :  { %v1730_v1 = vpop.eup %1729  ;;  %v376_v3 = vmul.f32 1.442695, %v365_v0  ;;  %v1669_v0 = vld [vmem:[%s2325_s7] sm:$0xff] }
 0x2cb   :  { %v392_v4 = vsel %vm337_vm8, %v1730_v1, 0.0  ;;  %536 = vmatpush.bf16.msra.mxu1 %v1669_v0 }
 0x2cc   :  { %1731 = vpow2.f32 %v376_v3  ;;  %393 = vadd.xlane.f32.xlu2 %v392_v4 }
 0x2cf   :  { %v352_v5 = vpop.xlane.xlu2 %351 }
 0x2d0   :  { %v366_v6 = vsub.f32 %v326_v37, %v352_v5 }
 0x2d2   :  { %v1732_v7 = vpop.eup %1731  ;;  %v378_v8 = vmul.f32 1.442695, %v366_v6 }
 0x2d3   :  { %v395_v9 = vsel %vm337_vm8, %v1732_v7, 0.0 }
 0x2d4   :  { %1733 = vpow2.f32 %v378_v8  ;;  %396 = vadd.xlane.f32.xlu0 %v395_v9 }
 0x2d7   :  { %v355_v11 = vpop.xlane.xlu0 %354 }
 0x2d8   :  { %v367_v12 = vsub.f32 %v329_v40, %v355_v11 }
 0x2da   :  { %v1734_v14 = vpop.eup %1733  ;;  %v380_v15 = vmul.f32 1.442695, %v367_v12 }
 0x2db   :  { %v398_v17 = vsel %vm337_vm8, %v1734_v14, 0.0 }
 0x2dc   :  { %1735 = vpow2.f32 %v380_v15  ;;  %399 = vadd.xlane.f32.xlu1 %v398_v17 }
 0x2df   :  { %v358_v18 = vpop.xlane.xlu1 %357 }
 0x2e0   :  { %v368_v20 = vsub.f32 %v332_v43, %v358_v18 }
 0x2e2   :  { %v1736_v21 = vpop.eup %1735  ;;  %v382_v23 = vmul.f32 1.442695, %v368_v20 }
 0x2e3   :  { %v401_v24 = vsel %vm337_vm8, %v1736_v21, 0.0 }
 0x2e4   :  { %1737 = vpow2.f32 %v382_v23  ;;  %402 = vadd.xlane.f32.xlu2 %v401_v24 }
 0x2e7   :  { %v361_v25 = vpop.xlane.xlu0 %360 }
 0x2e8   :  { %v369_v27 = vsub.f32 %v335_v46, %v361_v25 }
 0x2ea   :  { %v1738_v28 = vpop.eup %1737  ;;  %v384_v29 = vmul.f32 1.442695, %v369_v27  ;;  %v1702_v27 = vld [vmem:[%s2326_s8] ss:$0 sm:$0xff] }
 0x2eb   :  { %v404_v30 = vsel %vm337_vm8, %v1738_v28, 0.0 }
 0x2ec   :  { %1739 = vpow2.f32 %v384_v29  ;;  %405 = vadd.xlane.f32.xlu0 %v404_v30 }
 0x2f2   :  { %v1740_v31 = vpop.eup %1739 }
 0x2f3   :  { %v407_v32 = vsel %vm337_vm8, %v1740_v31, 0.0 }
 0x2f4   :  { %408 = vadd.xlane.f32.xlu1 %v407_v32 }
 0x32f   :  { %v388_v33 = vpop.xlane.xlu2 %387 }
 0x330   :  { %1741 = vrcp.f32 %v388_v33 }
 0x336   :  { %v1742_v34 = vpop.eup %1741 }
 0x337   :  { %v418_v35 = vmul.f32 %v1742_v34, %v1726_v55  ;;  %v391_v36 = vpop.xlane.xlu1 %390 }
 0x338   :  { %1743 = vrcp.f32 %v391_v36 }
 0x339   :  { %1499 = vmatmul.msk.f32.vlgmr.msra.gmra.mxu0 %vm337_vm8, %v418_v35 }
 0x33e   :  { %v1744_v37 = vpop.eup %1743 }
 0x33f   :  { %v394_v38 = vpop.xlane.xlu2 %393  ;;  %v419_v39 = vmul.f32 %v1744_v37, %v1728_v60 }
 0x340   :  { %1745 = vrcp.f32 %v394_v38 }
 0x341   :  { %1500 = vmatmul.msk.f32.gmra.mxu0 %vm337_vm8, %v419_v39 }
 0x346   :  { %v1746_v40 = vpop.eup %1745 }
 0x347   :  { %v397_v41 = vpop.xlane.xlu0 %396  ;;  %v420_v42 = vmul.f32 %v1746_v40, %v1730_v1 }
 0x348   :  { %1747 = vrcp.f32 %v397_v41 }
 0x349   :  { %1501 = vmatmul.msk.f32.gmra.mxu0 %vm337_vm8, %v420_v42 }
 0x34e   :  { %v1748_v43 = vpop.eup %1747 }
 0x34f   :  { %v400_v44 = vpop.xlane.xlu1 %399  ;;  %v421_v45 = vmul.f32 %v1748_v43, %v1732_v7 }
 0x350   :  { %1749 = vrcp.f32 %v400_v44 }
 0x351   :  { %1502 = vmatmul.msk.f32.gmra.mxu0 %vm337_vm8, %v421_v45 }
 0x356   :  { %v1750_v46 = vpop.eup %1749 }
 0x357   :  { %v403_v47 = vpop.xlane.xlu2 %402  ;;  %v422_v48 = vmul.f32 %v1750_v46, %v1734_v14  ;;  %v1671_v46 = vld [vmem:[%s2328_s10] sm:$0xff] }
 0x358   :  { %1751 = vrcp.f32 %v403_v47 }
 0x359   :  { %1503 = vmatmul.msk.f32.gmra.mxu0 %vm337_vm8, %v422_v48 }
 0x35e   :  { %v1752_v49 = vpop.eup %1751 }
 0x35f   :  { %v406_v50 = vpop.xlane.xlu0 %405  ;;  %v423_v51 = vmul.f32 %v1752_v49, %v1736_v21 }
 0x360   :  { %1753 = vrcp.f32 %v406_v50 }
 0x361   :  { %1504 = vmatmul.msk.f32.gmra.mxu0 %vm337_vm8, %v423_v51 }
 0x366   :  { %v1754_v52 = vpop.eup %1753 }
 0x367   :  { %v409_v55 = vpop.xlane.xlu1 %408  ;;  %v424_v56 = vmul.f32 %v1754_v52, %v1738_v28 }
 0x368   :  { %1755 = vrcp.f32 %v409_v55 }
 0x369   :  { %1505 = vmatmul.msk.f32.gmra.mxu0 %vm337_vm8, %v424_v56 }
 0x36e   :  { %v1756_v57 = vpop.eup %1755 }
 0x36f   :  { %v425_v58 = vmul.f32 %v1756_v57, %v1740_v31 }
 0x371   :  { %1506 = vmatmul.msk.f32.gmra.mxu0 %vm337_vm8, %v425_v58 }
 0x3b6   :  { %v467_v59 = vpop.f32.mrf.mxu0 }
 0x3b7   :  { %v491_v7 = vmul.f32 %v1994_v2, %v467_v59 }
 0x3be   :  { %v470_v60 = vpop.f32.mrf.mxu0 }
 0x3bf   :  { %v492_v8 = vmul.f32 %v1994_v2, %v470_v60 }
 0x3c6   :  { %v473_v61 = vpop.f32.mrf.mxu0 }
 0x3c7   :  { %v493_v5 = vmul.f32 %v2007_v13, %v473_v61 }
 0x3c9   :  { %v495_v12 = vadd.f32 %v493_v5, %v491_v7 }
 0x3ce   :  { %v476_v63 = vpop.f32.mrf.mxu0 }
 0x3cf   :  { %v494_v6 = vmul.f32 %v2007_v13, %v476_v63 }
 0x3d1   :  { %v496_v14 = vadd.f32 %v494_v6, %v492_v8 }
 0x3d6   :  { %v479_v1 = vpop.f32.mrf.mxu0 }
 0x3d7   :  { %v497_v9 = vmul.f32 %v2016_v16, %v479_v1 }
 0x3d9   :  { %v499_v18 = vadd.f32 %v497_v9, %v495_v12  ;;  %v1704_v9 = vld [vmem:[%s2327_s9 + $0x1] ss:$0 sm:$0xff] }
 0x3de   :  { %v482_v3 = vpop.f32.mrf.mxu0 }
 0x3df   :  { %v498_v11 = vmul.f32 %v2016_v16, %v482_v3 }
 0x3e1   :  { %v500_v20 = vadd.f32 %v498_v11, %v496_v14 }
 0x3e6   :  { %v485_v4 = vpop.f32.mrf.mxu0 }
 0x3e7   :  { %v501_v15 = vmul.f32 %v2025_v19, %v485_v4  ;;  %v1703_v4 = vld [vmem:[%s2327_s9] ss:$0 sm:$0xff] }
 0x3e9   :  { %v503_v23 = vadd.f32 %v501_v15, %v499_v18  ;;  %v1675_v18 = vld [vmem:[%s2330_s12 + $0x10] sm:$0xff] }
 0x3ee   :  { %v488_v17 = vpop.f32.mrf.mxu0 }
 0x3ef   :  { %v502_v21 = vmul.f32 %v2025_v19, %v488_v17  ;;  %v1676_v17 = vld [vmem:[%s2330_s12 + $0x18] sm:$0xff] }
 0x3f0   :  { %703 = vmatpush.bf16.msrb.mxu1 %v1676_v17  ;;  %v1681_v17 = vld [vmem:[%s2323_s5 + $0x50] sm:$0xff] }
 0x3f1   :  { %v504_v24 = vadd.f32 %v502_v21, %v500_v20  ;;  %v1674_v20 = vld [vmem:[%s2330_s12 + $0x8] sm:$0xff]  ;;  %v1705_v21 = vld [vmem:[%s2329_s11] ss:$0 sm:$0xff] }
 0x3f3   :  { %v505_v25 = vpack.c.bf16 %v504_v24, %v503_v23  ;;  %v1673_v23 = vld [vmem:[%s2330_s12] sm:$0xff] }
 0x3f4   :  { %704 = vmatpush.bf16.msrb.mxu1 %v1675_v18 }
 0x3f5   :  { %1515 = vmatmul.msk.bf16.vlgmr.msra.gmra.mxu1 %vm63_vm0, %v505_v25 }
 0x3f8   :  { %705 = vmatpush.bf16.msrb.mxu1 %v1674_v20 }
 0x3fc   :  { %706 = vmatpush.bf16.msrb.mxu1 %v1673_v23 }
 0x472   :  { %v538_v28 = vpop.f32.mrf.mxu1 }
 0x473   :  { %v539_v29 = vadd.f32 %v1702_v27, %v538_v28 }
 0x475   :  { %v543_v30 = vadd.f32 %v539_v29, %v1975_v53 }
 0x477   :  { %v548_v31 = vsel %vm63_vm0, %v543_v30, 0.0 }
 0x478   :  { %549 = vadd.xlane.f32.xlu2 %v548_v31 }
 0x47a   :  { %v540_v32 = vpop.f32.mrf.mxu1 }
 0x47b   :  { %v541_v33 = vadd.f32 %v1702_v27, %v540_v32 }
 0x47d   :  { %v544_v34 = vadd.f32 %v541_v33, %v1977_v54  ;;  %v1672_v54 = vld [vmem:[%s2328_s10 + $0x8] sm:$0xff] }
 0x47e   :  { %632 = vmatpush.bf16.msra.mxu2 %v1672_v54 }
 0x47f   :  { %v551_v35 = vsel %vm63_vm0, %v544_v34, 0.0 }
 0x480   :  { %552 = vadd.xlane.f32.xlu0 %v551_v35 }
 0x482   :  { %633 = vmatpush.bf16.msra.mxu2 %v1671_v46  ;;  %v1706_v46 = vld [vmem:[%s2331_s13] ss:$0 sm:$0xff] }
 0x4eb   :  { %v550_v36 = vpop.xlane.xlu2 %549 }
 0x4ec   :  { %v554_v37 = vmul.f32 %v550_v36, %v1943_v10 }
 0x4ee   :  { %v556_v38 = vsub.f32 %v543_v30, %v554_v37 }
 0x4f0   :  { %v558_v39 = vmul.f32 %v556_v38, %v556_v38 }
 0x4f2   :  { %v560_v40 = vsel %vm63_vm0, %v558_v39, 0.0 }
 0x4f3   :  { %v553_v41 = vpop.xlane.xlu0 %552  ;;  %561 = vadd.xlane.f32.xlu1 %v560_v40 }
 0x4f4   :  { %v555_v53 = vmul.f32 %v553_v41, %v1943_v10 }
 0x4f6   :  { %v557_v42 = vsub.f32 %v544_v34, %v555_v53 }
 0x4f8   :  { %v559_v43 = vmul.f32 %v557_v42, %v557_v42 }
 0x4fa   :  { %v563_v44 = vsel %vm63_vm0, %v559_v43, 0.0 }
 0x4fb   :  { %564 = vadd.xlane.f32.xlu2 %v563_v44 }
 0x566   :  { %v562_v45 = vpop.xlane.xlu1 %561 }
 0x567   :  { %v566_v47 = vmul.f32 %v562_v45, %v1943_v10 }
 0x569   :  { %v568_v48 = vadd.f32 1e-12, %v566_v47 }
 0x56b   :  { %1757 = vrsqrt.f32 %v568_v48  ;;  %vm576_vm10 = vweird.f32 %v568_v48 }
 0x56e   :  { %v565_v49 = vpop.xlane.xlu2 %564 }
 0x56f   :  { %v567_v50 = vmul.f32 %v565_v49, %v1943_v10 }
 0x571   :  { %v1758_v51 = vpop.eup %1757  ;;  %v569_v52 = vadd.f32 1e-12, %v567_v50 }
 0x572   :  { %v571_v55 = vmul.f32 %v1758_v51, %v568_v48  ;;  %vm577_vm9 = vweird.f32 %v1758_v51 }
 0x573   :  { %1759 = vrsqrt.f32 %v569_v52  ;;  %vm578_vm11 = vmor %vm576_vm10, %vm577_vm9  ;;  %vm586_vm13 = vweird.f32 %v569_v52 }
 0x574   :  { %v572_v56 = vmul.f32 %v1758_v51, %v571_v55 }
 0x576   :  { %v573_v57 = vmul.f32 0.5, %v572_v56 }
 0x578   :  { %v574_v58 = vsub.f32 1.5, %v573_v57 }
 0x579   :  { %v1760_v59 = vpop.eup %1759 }
 0x57a   :  { %v575_v60 = vmul.f32 %v1758_v51, %v574_v58  ;;  %v581_v61 = vmul.f32 %v1760_v59, %v569_v52  ;;  %vm587_vm12 = vweird.f32 %v1760_v59 }
 0x57b   :  { %vm588_vm14 = vmor %vm586_vm13, %vm587_vm12 }
 0x57c   :  { %v582_v62 = vmul.f32 %v1760_v59, %v581_v61  ;;  %v579_v63 = vsel %vm578_vm11, %v1758_v51, %v575_v60 }
 0x57d   :  { %v590_v3 = vmul.f32 %v579_v63, %v556_v38 }
 0x57e   :  { %v583_v0 = vmul.f32 0.5, %v582_v62 }
 0x57f   :  { %v595_v8 = vmul.f32 %v1703_v4, %v590_v3 }
 0x580   :  { %v584_v1 = vsub.f32 1.5, %v583_v0 }
 0x581   :  { %v600_v12 = vadd.f32 %v1704_v9, %v595_v8  ;;  %v1679_v8 = vld [vmem:[%s2323_s5 + $0x40] sm:$0xff] }
 0x582   :  { %v585_v5 = vmul.f32 %v1760_v59, %v584_v1 }
 0x584   :  { %v589_v6 = vsel %vm588_vm14, %v1760_v59, %v585_v5  ;;  %v1680_v5 = vld [vmem:[%s2323_s5 + $0x48] sm:$0xff] }
 0x585   :  { %v591_v7 = vmul.f32 %v589_v6, %v557_v42  ;;  %840 = vmatpush.bf16.msra.mxu1 %v1680_v5 }
 0x587   :  { %v596_v11 = vmul.f32 %v1703_v4, %v591_v7  ;;  %v1678_v4 = vld [vmem:[%s2323_s5 + $0x38] sm:$0xff]  ;;  %v1677_v7 = vld [vmem:[%s2323_s5 + $0x30] sm:$0xff] }
 0x588   :  { %804 = vmatpush.bf16.msrb.mxu2 %v1678_v4 }
 0x589   :  { %v601_v14 = vadd.f32 %v1704_v9, %v596_v11  ;;  %841 = vmatpush.bf16.msra.mxu1 %v1679_v8 }
 0x58b   :  { %v602_v15 = vpack.c.bf16 %v601_v14, %v600_v12 }
 0x58c   :  { %805 = vmatpush.bf16.msrb.mxu2 %v1677_v7 }
 0x58d   :  { %1525 = vmatmul.msk.bf16.vlgmr.msra.gmra.mxu2 %vm63_vm0, %v602_v15 }
 0x610   :  { %v635_v24 = vpop.f32.mrf.mxu2 }
 0x611   :  { %v636_v25 = vadd.f32 %v1705_v21, %v635_v24 }
 0x613   :  { %v640_v27 = vmul.f32 %v636_v25, %v636_v25 }
 0x615   :  { %v642_v28 = vmul.f32 %v640_v27, %v636_v25 }
 0x617   :  { %v644_v29 = vmul.f32 0.044715, %v642_v28 }
 0x618   :  { %v637_v30 = vpop.f32.mrf.mxu2 }
 0x619   :  { %v646_v31 = vadd.f32 %v644_v29, %v636_v25  ;;  %v638_v32 = vadd.f32 %v1705_v21, %v637_v30 }
 0x61b   :  { %v648_v33 = vmul.f32 0.7978846, %v646_v31  ;;  %v641_v34 = vmul.f32 %v638_v32, %v638_v32 }
 0x61d   :  { %v643_v35 = vmul.f32 %v641_v34, %v638_v32  ;;  %1761 = vtanh.f32 %v648_v33 }
 0x61f   :  { %v645_v36 = vmul.f32 0.044715, %v643_v35  ;;  %v1707_v35 = vld [vmem:[%s2332_s14] ss:$0 sm:$0xff] }
 0x621   :  { %v647_v37 = vadd.f32 %v645_v36, %v638_v32 }
 0x623   :  { %v649_v38 = vmul.f32 0.7978846, %v647_v37  ;;  %v1762_v39 = vpop.eup %1761 }
 0x624   :  { %v652_v40 = vadd.f32 1.0, %v1762_v39 }
 0x625   :  { %1763 = vtanh.f32 %v649_v38 }
 0x626   :  { %v654_v53 = vmul.f32 0.5, %v652_v40  ;;  %v1708_v40 = vld [vmem:[%s2332_s14 + $0x1] ss:$0 sm:$0xff] }
 0x628   :  { %v656_v44 = vmul.f32 %v654_v53, %v636_v25 }
 0x62b   :  { %v1764_v41 = vpop.eup %1763 }
 0x62c   :  { %v653_v42 = vadd.f32 1.0, %v1764_v41 }
 0x62e   :  { %v655_v43 = vmul.f32 0.5, %v653_v42 }
 0x630   :  { %v657_v54 = vmul.f32 %v655_v43, %v638_v32 }
 0x632   :  { %v658_v45 = vpack.c.bf16 %v657_v54, %v656_v44  ;;  %v1710_v54 = vld [vmem:[%s2324_s6 + $0x3] ss:$0 sm:$0xff] }
 0x634   :  { %1542 = vmatmul.msk.bf16.vlgmr.msrb.gmra.mxu1 %vm695_vm15, %v658_v45 }
 0x6b1   :  { %v708_v47 = vpop.f32.mrf.mxu1 }
 0x6b2   :  { %v709_v48 = vadd.f32 %v1706_v46, %v708_v47 }
 0x6b4   :  { %v713_v49 = vadd.f32 %v709_v48, %v600_v12  ;;  %v1682_v12 = vld [vmem:[%s2323_s5 + $0x58] sm:$0xff] }
 0x6b5   :  { %876 = vmatpush.bf16.msra.mxu2 %v1682_v12 }
 0x6b6   :  { %v718_v50 = vsel %vm63_vm0, %v713_v49, 0.0 }
 0x6b7   :  { %719 = vadd.xlane.f32.xlu0 %v718_v50 }
 0x6b9   :  { %v710_v51 = vpop.f32.mrf.mxu1  ;;  %877 = vmatpush.bf16.msra.mxu2 %v1681_v17 }
 0x6ba   :  { %v711_v52 = vadd.f32 %v1706_v46, %v710_v51  ;;  %v1709_v46 = vld [vmem:[%s2324_s6 + $0x4] ss:$0 sm:$0xff] }
 0x6bc   :  { %v714_v55 = vadd.f32 %v711_v52, %v601_v14 }
 0x6be   :  { %v721_v56 = vsel %vm63_vm0, %v714_v55, 0.0 }
 0x6bf   :  { %722 = vadd.xlane.f32.xlu1 %v721_v56 }
 0x72a   :  { %v720_v57 = vpop.xlane.xlu0 %719 }
 0x72b   :  { %v724_v58 = vmul.f32 %v720_v57, %v1943_v10 }
 0x72d   :  { %v726_v59 = vsub.f32 %v713_v49, %v724_v58 }
 0x72f   :  { %v728_v60 = vmul.f32 %v726_v59, %v726_v59 }
 0x731   :  { %v730_v61 = vsel %vm63_vm0, %v728_v60, 0.0  ;;  %v1711_v60 = vld [vmem:[%s2324_s6 + $0x5] ss:$0 sm:$0xff] }
 0x732   :  { %v723_v62 = vpop.xlane.xlu1 %722  ;;  %731 = vadd.xlane.f32.xlu2 %v730_v61 }
 0x733   :  { %v725_v63 = vmul.f32 %v723_v62, %v1943_v10 }
 0x735   :  { %v727_v0 = vsub.f32 %v714_v55, %v725_v63 }
 0x737   :  { %v729_v1 = vmul.f32 %v727_v0, %v727_v0 }
 0x739   :  { %v733_v3 = vsel %vm63_vm0, %v729_v1, 0.0 }
 0x73a   :  { %734 = vadd.xlane.f32.xlu0 %v733_v3 }
 0x7a5   :  { %v732_v6 = vpop.xlane.xlu2 %731 }
 0x7a6   :  { %v736_v9 = vmul.f32 %v732_v6, %v1943_v10 }
 0x7a8   :  { %v738_v11 = vadd.f32 1e-12, %v736_v9 }
 0x7aa   :  { %1765 = vrsqrt.f32 %v738_v11  ;;  %vm746_vm2 = vweird.f32 %v738_v11 }
 0x7ad   :  { %v735_v14 = vpop.xlane.xlu0 %734 }
 0x7ae   :  { %v737_v15 = vmul.f32 %v735_v14, %v1943_v10 }
 0x7b0   :  { %v1766_v18 = vpop.eup %1765  ;;  %v739_v20 = vadd.f32 1e-12, %v737_v15 }
 0x7b1   :  { %v741_v21 = vmul.f32 %v1766_v18, %v738_v11  ;;  %vm747_vm1 = vweird.f32 %v1766_v18 }
 0x7b2   :  { %1767 = vrsqrt.f32 %v739_v20  ;;  %vm748_vm3 = vmor %vm746_vm2, %vm747_vm1  ;;  %vm756_vm5 = vweird.f32 %v739_v20 }
 0x7b3   :  { %v742_v23 = vmul.f32 %v1766_v18, %v741_v21 }
 0x7b5   :  { %v743_v24 = vmul.f32 0.5, %v742_v23 }
 0x7b7   :  { %v744_v25 = vsub.f32 1.5, %v743_v24 }
 0x7b8   :  { %v1768_v27 = vpop.eup %1767 }
 0x7b9   :  { %v745_v28 = vmul.f32 %v1766_v18, %v744_v25  ;;  %v751_v29 = vmul.f32 %v1768_v27, %v739_v20  ;;  %vm757_vm4 = vweird.f32 %v1768_v27 }
 0x7ba   :  { %vm758_vm6 = vmor %vm756_vm5, %vm757_vm4  ;;  %vm1430_vm4 = vcmask 254976  }
 0x7bb   :  { %v752_v30 = vmul.f32 %v1768_v27, %v751_v29  ;;  %v749_v31 = vsel %vm748_vm3, %v1766_v18, %v745_v28 }
 0x7bc   :  { %v760_v34 = vmul.f32 %v749_v31, %v726_v59 }
 0x7bd   :  { %v753_v32 = vmul.f32 0.5, %v752_v30 }
 0x7be   :  { %v765_v39 = vmul.f32 %v1707_v35, %v760_v34 }
 0x7bf   :  { %v754_v33 = vsub.f32 1.5, %v753_v32 }
 0x7c0   :  { %v2165_v53 = vadd.f32 %v1708_v40, %v765_v39 }
 0x7c1   :  { %v755_v36 = vmul.f32 %v1768_v27, %v754_v33 }
 0x7c3   :  { %v759_v37 = vsel %vm758_vm6, %v1768_v27, %v755_v36 }
 0x7c4   :  { %v761_v38 = vmul.f32 %v759_v37, %v727_v0 }
 0x7c6   :  { %v766_v41 = vmul.f32 %v1707_v35, %v761_v38 }
 0x7c8   :  { %v2167_v42 = vadd.f32 %v1708_v40, %v766_v41 }
 0x7ca   :  { %v772_v43 = vpack.c.bf16 %v2167_v42, %v2165_v53 }
 0x7cc   :  { %1557 = vmatmul.msk.bf16.vlgmr.msrb.gmra.mxu2 %vm63_vm0, %v772_v43  ;;  %1571 = vmatmul.msk.bf16.vlgmr.msra.gmra.mxu1 %vm63_vm0, %v772_v43 }
 0x7dc   :  { %1585 = vmatmul.msk.bf16.vlgmr.msra.gmra.mxu2 %vm63_vm0, %v772_v43 }
 0x849   :  { %v843_v44 = vpop.f32.mrf.mxu1 }
 0x84a   :  { %v844_v51 = vadd.f32 %v1709_v46, %v843_v44 }
 0x84f   :  { %v807_v45 = vpop.f32.mrf.mxu2 }
 0x850   :  { %v808_v47 = vadd.f32 %v1710_v54, %v807_v45 }
 0x851   :  { %v845_v48 = vpop.f32.mrf.mxu1 }
 0x852   :  { %v846_v49 = vadd.f32 %v1709_v46, %v845_v48  ;;  %v884_v50 = vmul.f32 0.35355338, %v808_v47 }
 0x854   :  { %1586 = vmatpush.xpose.msk.msrb.mxu1 %vm63_vm0, %v846_v49  ;;  %v886_v55 = vmul.f32 %v1994_v2, %v884_v50  ;;  %v888_v63 = vmul.f32 %v2007_v13, %v884_v50  ;;  %v892_v4 = vmul.f32 %v2025_v19, %v884_v50 }
 0x857   :  { %v809_v52 = vpop.f32.mrf.mxu2 }
 0x858   :  { %1587 = vmatpush.xpose.msk.msrb.mxu1 %vm63_vm0, %v844_v51  ;;  %v810_v56 = vadd.f32 %v1710_v54, %v809_v52 }
 0x85a   :  { %v885_v57 = vmul.f32 0.35355338, %v810_v56 }
 0x85b   :  { %1588 = vmatmul.msk.f32.vlgmr.msrb.gmra.mxu1 %vm63_vm0, %v886_v55 }
 0x85c   :  { %v887_v59 = vmul.f32 %v1994_v2, %v885_v57  ;;  %v889_v1 = vmul.f32 %v2007_v13, %v885_v57  ;;  %v890_v2 = vmul.f32 %v2016_v16, %v884_v50  ;;  %v891_v3 = vmul.f32 %v2016_v16, %v885_v57 }
 0x85d   :  { %v893_v5 = vmul.f32 %v2025_v19, %v885_v57 }
 0x85f   :  { %v879_v58 = vpop.f32.mrf.mxu2 }
 0x860   :  { %v880_v0 = vadd.f32 %v1711_v60, %v879_v58 }
 0x863   :  { %1589 = vmatmul.msk.f32.gmra.mxu1 %vm63_vm0, %v887_v59 }
 0x867   :  { %v881_v61 = vpop.f32.mrf.mxu2 }
 0x868   :  { %v882_v62 = vadd.f32 %v1711_v60, %v881_v61 }
 0x86a   :  { %1091 = vmatpush.msrb.mxu2 %v882_v62 }
 0x86b   :  { %1590 = vmatmul.msk.f32.gmra.mxu1 %vm63_vm0, %v888_v63 }
 0x86c   :  { %1092 = vmatpush.msrb.mxu2 %v880_v0 }
 0x873   :  { %1591 = vmatmul.msk.f32.gmra.mxu1 %vm63_vm0, %v889_v1 }
 0x87b   :  { %1592 = vmatmul.msk.f32.gmra.mxu1 %vm63_vm0, %v890_v2 }
 0x883   :  { %1593 = vmatmul.msk.f32.gmra.mxu1 %vm63_vm0, %v891_v3 }
 0x88b   :  { %1594 = vmatmul.msk.f32.gmra.mxu1 %vm63_vm0, %v892_v4 }
 0x893   :  { %1595 = vmatmul.msk.f32.gmra.mxu1 %vm63_vm0, %v893_v5 }
 0x8d8   :  { %v941_v6 = vpop.f32.mrf.mxu1 }
 0x8d9   :  { %v942_v13 = vadd.f32 %v941_v6, %v2034_v22 }
 0x8db   :  { %v965_v7 = vsel %vm337_vm8, %v942_v13, -inf }
 0x8dc   :  { %966 = vmax.xlane.f32.xlu1 %v965_v7 }
 0x8e0   :  { %v944_v8 = vpop.f32.mrf.mxu1 }
 0x8e1   :  { %v945_v9 = vadd.f32 %v944_v8, %v2041_v26 }
 0x8e3   :  { %v968_v16 = vsel %vm337_vm8, %v945_v9, -inf }
 0x8e4   :  { %969 = vmax.xlane.f32.xlu2 %v968_v16 }
 0x8e8   :  { %v947_v11 = vpop.f32.mrf.mxu1 }
 0x8e9   :  { %v948_v12 = vadd.f32 %v947_v11, %v2034_v22 }
 0x8eb   :  { %v971_v14 = vsel %vm337_vm8, %v948_v12, -inf }
 0x8ec   :  { %972 = vmax.xlane.f32.xlu0 %v971_v14 }
 0x8f0   :  { %v950_v19 = vpop.f32.mrf.mxu1 }
 0x8f1   :  { %v951_v15 = vadd.f32 %v950_v19, %v2041_v26 }
 0x8f3   :  { %v974_v17 = vsel %vm337_vm8, %v951_v15, -inf }
 0x8f4   :  { %975 = vmax.xlane.f32.xlu1 %v974_v17 }
 0x8f8   :  { %v953_v18 = vpop.f32.mrf.mxu1 }
 0x8f9   :  { %v954_v20 = vadd.f32 %v953_v18, %v2034_v22 }
 0x8fb   :  { %v977_v21 = vsel %vm337_vm8, %v954_v20, -inf }
 0x8fc   :  { %978 = vmax.xlane.f32.xlu2 %v977_v21 }
 0x900   :  { %v956_v23 = vpop.f32.mrf.mxu1 }
 0x901   :  { %v957_v24 = vadd.f32 %v956_v23, %v2041_v26 }
 0x903   :  { %v980_v25 = vsel %vm337_vm8, %v957_v24, -inf }
 0x904   :  { %981 = vmax.xlane.f32.xlu0 %v980_v25 }
 0x908   :  { %v959_v27 = vpop.f32.mrf.mxu1 }
 0x909   :  { %v960_v28 = vadd.f32 %v959_v27, %v2034_v22 }
 0x90b   :  { %v983_v29 = vsel %vm337_vm8, %v960_v28, -inf }
 0x90c   :  { %984 = vmax.xlane.f32.xlu1 %v983_v29 }
 0x910   :  { %v962_v30 = vpop.f32.mrf.mxu1 }
 0x911   :  { %v963_v31 = vadd.f32 %v962_v30, %v2041_v26 }
 0x913   :  { %v986_v32 = vsel %vm337_vm8, %v963_v31, -inf }
 0x914   :  { %987 = vmax.xlane.f32.xlu0 %v986_v32 }
 0x94f   :  { %v967_v33 = vpop.xlane.xlu1 %966 }
 0x950   :  { %v989_v34 = vsub.f32 %v942_v13, %v967_v33 }
 0x952   :  { %v997_v35 = vmul.f32 1.442695, %v989_v34 }
 0x954   :  { %1769 = vpow2.f32 %v997_v35 }
 0x957   :  { %v970_v36 = vpop.xlane.xlu2 %969 }
 0x958   :  { %v990_v37 = vsub.f32 %v945_v9, %v970_v36  ;;  %v1684_v36 = vld [vmem:[%s2325_s7 + $0x18] sm:$0xff] }
 0x959   :  { %1164 = vmatpush.bf16.msra.mxu3 %v1684_v36 }
 0x95a   :  { %v1770_v38 = vpop.eup %1769  ;;  %v999_v39 = vmul.f32 1.442695, %v990_v37 }
 0x95b   :  { %v1013_v40 = vsel %vm337_vm8, %v1770_v38, 0.0 }
 0x95c   :  { %1771 = vpow2.f32 %v999_v39  ;;  %1014 = vadd.xlane.f32.xlu2 %v1013_v40  ;;  %v1683_v39 = vld [vmem:[%s2325_s7 + $0x10] sm:$0xff] }
 0x95d   :  { %1165 = vmatpush.bf16.msra.mxu3 %v1683_v39 }
 0x95f   :  { %v973_v22 = vpop.xlane.xlu0 %972 }
 0x960   :  { %v991_v41 = vsub.f32 %v948_v12, %v973_v22 }
 0x962   :  { %v1772_v43 = vpop.eup %1771  ;;  %v1001_v44 = vmul.f32 1.442695, %v991_v41 }
 0x963   :  { %v1016_v26 = vsel %vm337_vm8, %v1772_v43, 0.0 }
 0x964   :  { %1773 = vpow2.f32 %v1001_v44  ;;  %1017 = vadd.xlane.f32.xlu1 %v1016_v26  ;;  %v1813_v26 = vld [vmem:[%s2321_s3 + $0x1] ss:$0 sm:$0xff] }
 0x967   :  { %v976_v54 = vpop.xlane.xlu1 %975 }
 0x968   :  { %v992_v45 = vsub.f32 %v951_v15, %v976_v54 }
 0x96a   :  { %v1774_v46 = vpop.eup %1773  ;;  %v1003_v47 = vmul.f32 1.442695, %v992_v45 }
 0x96b   :  { %v1019_v48 = vsel %vm337_vm8, %v1774_v46, 0.0 }
 0x96c   :  { %1775 = vpow2.f32 %v1003_v47  ;;  %1020 = vadd.xlane.f32.xlu2 %v1019_v48 }
 0x96f   :  { %v979_v49 = vpop.xlane.xlu2 %978 }
 0x970   :  { %v993_v50 = vsub.f32 %v954_v20, %v979_v49  ;;  %v1815_v49 = vld [vmem:[%s2321_s3 + $0x2] ss:$0 sm:$0xff] }
 0x972   :  { %v1776_v51 = vpop.eup %1775  ;;  %v1005_v52 = vmul.f32 1.442695, %v993_v50 }
 0x973   :  { %v1022_v55 = vsel %vm337_vm8, %v1776_v51, 0.0 }
 0x974   :  { %1777 = vpow2.f32 %v1005_v52  ;;  %1023 = vadd.xlane.f32.xlu0 %v1022_v55 }
 0x977   :  { %v982_v56 = vpop.xlane.xlu0 %981 }
 0x978   :  { %v994_v57 = vsub.f32 %v957_v24, %v982_v56  ;;  %v1816_v56 = vld [vmem:[%s2321_s3 + $0x3] ss:$0 sm:$0xff] }
 0x97a   :  { %v1778_v58 = vpop.eup %1777  ;;  %v1007_v59 = vmul.f32 1.442695, %v994_v57 }
 0x97b   :  { %v1025_v60 = vsel %vm337_vm8, %v1778_v58, 0.0 }
 0x97c   :  { %1779 = vpow2.f32 %v1007_v59  ;;  %1026 = vadd.xlane.f32.xlu1 %v1025_v60 }
 0x97f   :  { %v985_v61 = vpop.xlane.xlu1 %984 }
 0x980   :  { %v995_v62 = vsub.f32 %v960_v28, %v985_v61 }
 0x982   :  { %v1780_v63 = vpop.eup %1779  ;;  %v1009_v0 = vmul.f32 1.442695, %v995_v62 }
 0x983   :  { %v1028_v1 = vsel %vm337_vm8, %v1780_v63, 0.0 }
 0x984   :  { %1781 = vpow2.f32 %v1009_v0  ;;  %1029 = vadd.xlane.f32.xlu2 %v1028_v1  ;;  %v1712_v1 = vld [vmem:[%s2326_s8 + $0x1] ss:$0 sm:$0xff]  ;;  %s1439_s8 = sshll.u32 %s2335_s17, 4  ;;  %s1440_s8 = int_to_ptr.hbm [resolvable:$true] %s1439_s8 }
 0x987   :  { %v988_v2 = vpop.xlane.xlu0 %987 }
 0x988   :  { %v996_v3 = vsub.f32 %v963_v31, %v988_v2 }
 0x98a   :  { %v1782_v4 = vpop.eup %1781  ;;  %v1011_v5 = vmul.f32 1.442695, %v996_v3 }
 0x98b   :  { %v1031_v6 = vsel %vm337_vm8, %v1782_v4, 0.0 }
 0x98c   :  { %1783 = vpow2.f32 %v1011_v5  ;;  %1032 = vadd.xlane.f32.xlu0 %v1031_v6 }
 0x992   :  { %v1784_v13 = vpop.eup %1783 }
 0x993   :  { %v1034_v7 = vsel %vm337_vm8, %v1784_v13, 0.0 }
 0x994   :  { %1035 = vadd.xlane.f32.xlu1 %v1034_v7 }
 0x9cf   :  { %v1015_v8 = vpop.xlane.xlu2 %1014 }
 0x9d0   :  { %1785 = vrcp.f32 %v1015_v8 }
 0x9d6   :  { %v1786_v9 = vpop.eup %1785 }
 0x9d7   :  { %v1045_v16 = vmul.f32 %v1786_v9, %v1770_v38  ;;  %v1018_v11 = vpop.xlane.xlu1 %1017  ;;  %v1686_v9 = vld [vmem:[%s2328_s10 + $0x18] sm:$0xff] }
 0x9d8   :  { %1787 = vrcp.f32 %v1018_v11  ;;  %1264 = vmatpush.bf16.msrb.mxu0 %v1686_v9 }
 0x9d9   :  { %1596 = vmatmul.msk.f32.vlgmr.msrb.gmra.mxu2 %vm337_vm8, %v1045_v16 }
 0x9de   :  { %v1788_v12 = vpop.eup %1787 }
 0x9df   :  { %v1021_v14 = vpop.xlane.xlu2 %1020  ;;  %v1046_v19 = vmul.f32 %v1788_v12, %v1772_v43 }
 0x9e0   :  { %1789 = vrcp.f32 %v1021_v14 }
 0x9e1   :  { %1597 = vmatmul.msk.f32.gmra.mxu2 %vm337_vm8, %v1046_v19 }
 0x9e6   :  { %v1790_v15 = vpop.eup %1789 }
 0x9e7   :  { %v1024_v17 = vpop.xlane.xlu0 %1023  ;;  %v1047_v18 = vmul.f32 %v1790_v15, %v1774_v46  ;;  %v1814_v46 = vld [vmem:[%s2321_s3] ss:$0 sm:$0xff] }
 0x9e8   :  { %1791 = vrcp.f32 %v1024_v17 }
 0x9e9   :  { %1598 = vmatmul.msk.f32.gmra.mxu2 %vm337_vm8, %v1047_v18 }
 0x9ee   :  { %v1792_v20 = vpop.eup %1791 }
 0x9ef   :  { %v1027_v21 = vpop.xlane.xlu1 %1026  ;;  %v1048_v23 = vmul.f32 %v1792_v20, %v1776_v51 }
 0x9f0   :  { %1793 = vrcp.f32 %v1027_v21 }
 0x9f1   :  { %1599 = vmatmul.msk.f32.gmra.mxu2 %vm337_vm8, %v1048_v23  ;;  %v1685_v23 = vld [vmem:[%s2328_s10 + $0x10] sm:$0xff] }
 0x9f2   :  { %1265 = vmatpush.bf16.msrb.mxu0 %v1685_v23 }
 0x9f6   :  { %v1794_v24 = vpop.eup %1793 }
 0x9f7   :  { %v1030_v25 = vpop.xlane.xlu2 %1029  ;;  %v1049_v27 = vmul.f32 %v1794_v24, %v1778_v58 }
 0x9f8   :  { %1795 = vrcp.f32 %v1030_v25 }
 0x9f9   :  { %1600 = vmatmul.msk.f32.gmra.mxu2 %vm337_vm8, %v1049_v27 }
 0x9fe   :  { %v1796_v28 = vpop.eup %1795 }
 0x9ff   :  { %v1033_v29 = vpop.xlane.xlu0 %1032  ;;  %v1050_v30 = vmul.f32 %v1796_v28, %v1780_v63 }
 0xa00   :  { %1797 = vrcp.f32 %v1033_v29 }
 0xa01   :  { %1601 = vmatmul.msk.f32.gmra.mxu2 %vm337_vm8, %v1050_v30 }
 0xa06   :  { %v1798_v31 = vpop.eup %1797 }
 0xa07   :  { %v1036_v32 = vpop.xlane.xlu1 %1035  ;;  %v1051_v33 = vmul.f32 %v1798_v31, %v1782_v4 }
 0xa08   :  { %1799 = vrcp.f32 %v1036_v32 }
 0xa09   :  { %1602 = vmatmul.msk.f32.gmra.mxu2 %vm337_vm8, %v1051_v33 }
 0xa0e   :  { %v1800_v34 = vpop.eup %1799 }
 0xa0f   :  { %v1052_v35 = vmul.f32 %v1800_v34, %v1784_v13 }
 0xa11   :  { %1603 = vmatmul.msk.f32.gmra.mxu2 %vm337_vm8, %v1052_v35 }
 0xa5c   :  { %v1094_v37 = vpop.f32.mrf.mxu2 }
 0xa5d   :  { %v1118_v47 = vmul.f32 %v1814_v46, %v1094_v37 }
 0xa64   :  { %v1097_v38 = vpop.f32.mrf.mxu2 }
 0xa65   :  { %v1119_v48 = vmul.f32 %v1814_v46, %v1097_v38 }
 0xa6c   :  { %v1100_v40 = vpop.f32.mrf.mxu2 }
 0xa6d   :  { %v1120_v54 = vmul.f32 %v1813_v26, %v1100_v40 }
 0xa6f   :  { %v1122_v52 = vadd.f32 %v1120_v54, %v1118_v47 }
 0xa74   :  { %v1103_v22 = vpop.f32.mrf.mxu2 }
 0xa75   :  { %v1121_v45 = vmul.f32 %v1813_v26, %v1103_v22  ;;  %v1713_v22 = vld [vmem:[%s2327_s9 + $0x2] ss:$0 sm:$0xff]  ;;  %v1714_v26 = vld [vmem:[%s2327_s9 + $0x3] ss:$0 sm:$0xff] }
 0xa77   :  { %v1123_v55 = vadd.f32 %v1121_v45, %v1119_v48 }
 0xa7c   :  { %v1106_v41 = vpop.f32.mrf.mxu2 }
 0xa7d   :  { %v1124_v50 = vmul.f32 %v1815_v49, %v1106_v41 }
 0xa7f   :  { %v1126_v59 = vadd.f32 %v1124_v50, %v1122_v52  ;;  %v1690_v50 = vld [vmem:[%s2330_s12 + $0x38] sm:$0xff]  ;;  %v1688_v52 = vld [vmem:[%s2330_s12 + $0x28] sm:$0xff] }
 0xa80   :  { %1336 = vmatpush.bf16.msrb.mxu3 %v1690_v50 }
 0xa84   :  { %v1109_v43 = vpop.f32.mrf.mxu2 }
 0xa85   :  { %v1125_v51 = vmul.f32 %v1815_v49, %v1109_v43 }
 0xa87   :  { %v1127_v60 = vadd.f32 %v1125_v51, %v1123_v55  ;;  %v1689_v51 = vld [vmem:[%s2330_s12 + $0x30] sm:$0xff]  ;;  %v1715_v55 = vld [vmem:[%s2329_s11 + $0x1] ss:$0 sm:$0xff] }
 0xa88   :  { %1337 = vmatpush.bf16.msrb.mxu3 %v1689_v51 }
 0xa8c   :  { %v1112_v44 = vpop.f32.mrf.mxu2  ;;  %1338 = vmatpush.bf16.msrb.mxu3 %v1688_v52 }
 0xa8d   :  { %v1128_v57 = vmul.f32 %v1816_v56, %v1112_v44 }
 0xa8f   :  { %v1130_v62 = vadd.f32 %v1128_v57, %v1126_v59 }
 0xa94   :  { %v1115_v58 = vpop.f32.mrf.mxu2 }
 0xa95   :  { %v1129_v61 = vmul.f32 %v1816_v56, %v1115_v58  ;;  %v1687_v56 = vld [vmem:[%s2330_s12 + $0x20] sm:$0xff] }
 0xa96   :  { %1339 = vmatpush.bf16.msrb.mxu3 %v1687_v56 }
 0xa97   :  { %v1131_v63 = vadd.f32 %v1129_v61, %v1127_v60 }
 0xa99   :  { %v1132_v0 = vpack.c.bf16 %v1131_v63, %v1130_v62 }
 0xa9b   :  { %1617 = vmatmul.msk.bf16.vlgmr.msra.gmra.mxu3 %vm63_vm0, %v1132_v0 }
 0xb1e   :  { %v1167_v2 = vpop.f32.mrf.mxu3 }
 0xb1f   :  { %v1168_v3 = vadd.f32 %v1712_v1, %v1167_v2 }
 0xb21   :  { %v1172_v4 = vadd.f32 %v1168_v3, %v2165_v53 }
 0xb23   :  { %v1178_v5 = vsel %vm63_vm0, %v1172_v4, 0.0 }
 0xb24   :  { %1179 = vadd.xlane.f32.xlu2 %v1178_v5 }
 0xb26   :  { %v1169_v6 = vpop.f32.mrf.mxu3 }
 0xb27   :  { %v1170_v13 = vadd.f32 %v1712_v1, %v1169_v6 }
 0xb29   :  { %v1173_v7 = vadd.f32 %v1170_v13, %v2167_v42 }
 0xb2b   :  { %v1181_v8 = vsel %vm63_vm0, %v1173_v7, 0.0 }
 0xb2c   :  { %1182 = vadd.xlane.f32.xlu0 %v1181_v8 }
 0xb97   :  { %v1180_v16 = vpop.xlane.xlu2 %1179 }
 0xb98   :  { %v1184_v11 = vmul.f32 %v1180_v16, %v1943_v10 }
 0xb9a   :  { %v1186_v12 = vsub.f32 %v1172_v4, %v1184_v11 }
 0xb9c   :  { %v1188_v53 = vmul.f32 %v1186_v12, %v1186_v12 }
 0xb9e   :  { %v1190_v14 = vsel %vm63_vm0, %v1188_v53, 0.0 }
 0xb9f   :  { %v1183_v19 = vpop.xlane.xlu0 %1182  ;;  %1191 = vadd.xlane.f32.xlu1 %v1190_v14 }
 0xba0   :  { %v1185_v15 = vmul.f32 %v1183_v19, %v1943_v10  ;;  %v1716_v19 = vld [vmem:[%s2331_s13 + $0x1] ss:$0 sm:$0xff] }
 0xba2   :  { %v1187_v42 = vsub.f32 %v1173_v7, %v1185_v15 }
 0xba4   :  { %v1189_v17 = vmul.f32 %v1187_v42, %v1187_v42 }
 0xba6   :  { %v1193_v18 = vsel %vm63_vm0, %v1189_v17, 0.0 }
 0xba7   :  { %1194 = vadd.xlane.f32.xlu2 %v1193_v18 }
 0xc12   :  { %v1192_v20 = vpop.xlane.xlu1 %1191 }
 0xc13   :  { %v1196_v21 = vmul.f32 %v1192_v20, %v1943_v10 }
 0xc15   :  { %v1198_v24 = vadd.f32 1e-12, %v1196_v21 }
 0xc17   :  { %1801 = vrsqrt.f32 %v1198_v24  ;;  %vm1206_vm9 = vweird.f32 %v1198_v24 }
 0xc1a   :  { %v1195_v25 = vpop.xlane.xlu2 %1194 }
 0xc1b   :  { %v1197_v27 = vmul.f32 %v1195_v25, %v1943_v10 }
 0xc1d   :  { %v1802_v28 = vpop.eup %1801  ;;  %v1199_v29 = vadd.f32 1e-12, %v1197_v27 }
 0xc1e   :  { %v1201_v30 = vmul.f32 %v1802_v28, %v1198_v24  ;;  %vm1207_vm7 = vweird.f32 %v1802_v28 }
 0xc1f   :  { %1803 = vrsqrt.f32 %v1199_v29  ;;  %vm1208_vm10 = vmor %vm1206_vm9, %vm1207_vm7  ;;  %vm1216_vm12 = vweird.f32 %v1199_v29 }
 0xc20   :  { %v1202_v31 = vmul.f32 %v1802_v28, %v1201_v30 }
 0xc22   :  { %v1203_v32 = vmul.f32 0.5, %v1202_v31 }
 0xc24   :  { %v1204_v33 = vsub.f32 1.5, %v1203_v32 }
 0xc25   :  { %v1804_v34 = vpop.eup %1803 }
 0xc26   :  { %v1205_v35 = vmul.f32 %v1802_v28, %v1204_v33  ;;  %v1211_v36 = vmul.f32 %v1804_v34, %v1199_v29  ;;  %vm1217_vm11 = vweird.f32 %v1804_v34 }
 0xc27   :  { %vm1218_vm13 = vmor %vm1216_vm12, %vm1217_vm11 }
 0xc28   :  { %v1212_v37 = vmul.f32 %v1804_v34, %v1211_v36  ;;  %v1209_v38 = vsel %vm1208_vm10, %v1802_v28, %v1205_v35 }
 0xc29   :  { %v1220_v41 = vmul.f32 %v1209_v38, %v1186_v12 }
 0xc2a   :  { %v1213_v39 = vmul.f32 0.5, %v1212_v37 }
 0xc2b   :  { %v1225_v54 = vmul.f32 %v1713_v22, %v1220_v41 }
 0xc2c   :  { %v1214_v40 = vsub.f32 1.5, %v1213_v39 }
 0xc2d   :  { %v1230_v47 = vadd.f32 %v1714_v26, %v1225_v54 }
 0xc2e   :  { %v1215_v43 = vmul.f32 %v1804_v34, %v1214_v40 }
 0xc30   :  { %v1219_v44 = vsel %vm1218_vm13, %v1804_v34, %v1215_v43 }
 0xc31   :  { %v1221_v45 = vmul.f32 %v1219_v44, %v1187_v42 }
 0xc33   :  { %v1226_v46 = vmul.f32 %v1713_v22, %v1221_v45 }
 0xc35   :  { %v1231_v48 = vadd.f32 %v1714_v26, %v1226_v46 }
 0xc37   :  { %v1232_v49 = vpack.c.bf16 %v1231_v48, %v1230_v47 }
 0xc39   :  { %1633 = vmatmul.msk.bf16.vlgmr.msrb.gmra.mxu0 %vm63_vm0, %v1232_v49 }
 0xcb6   :  { %v1267_v57 = vpop.f32.mrf.mxu0 }
 0xcb7   :  { %v1268_v58 = vadd.f32 %v1715_v55, %v1267_v57 }
 0xcb9   :  { %v1272_v59 = vmul.f32 %v1268_v58, %v1268_v58 }
 0xcbb   :  { %v1274_v60 = vmul.f32 %v1272_v59, %v1268_v58  ;;  %v1718_v59 = vld [vmem:[%s2332_s14 + $0x3] ss:$0 sm:$0xff] }
 0xcbd   :  { %v1276_v61 = vmul.f32 0.044715, %v1274_v60 }
 0xcbe   :  { %v1269_v62 = vpop.f32.mrf.mxu0 }
 0xcbf   :  { %v1278_v63 = vadd.f32 %v1276_v61, %v1268_v58  ;;  %v1270_v0 = vadd.f32 %v1715_v55, %v1269_v62 }
 0xcc1   :  { %v1280_v1 = vmul.f32 0.7978846, %v1278_v63  ;;  %v1273_v2 = vmul.f32 %v1270_v0, %v1270_v0  ;;  %v1406_v63 = vld [vmem:[%s2320_s2] sm:$0x3] }
 0xcc3   :  { %v1275_v3 = vmul.f32 %v1273_v2, %v1270_v0  ;;  %1805 = vtanh.f32 %v1280_v1 }
 0xcc5   :  { %v1277_v4 = vmul.f32 0.044715, %v1275_v3 }
 0xcc7   :  { %v1279_v5 = vadd.f32 %v1277_v4, %v1270_v0 }
 0xcc9   :  { %v1281_v6 = vmul.f32 0.7978846, %v1279_v5  ;;  %v1806_v13 = vpop.eup %1805 }
 0xcca   :  { %v1284_v7 = vadd.f32 1.0, %v1806_v13 }
 0xccb   :  { %1807 = vtanh.f32 %v1281_v6 }
 0xccc   :  { %v1286_v9 = vmul.f32 0.5, %v1284_v7 }
 0xcce   :  { %v1288_v12 = vmul.f32 %v1286_v9, %v1268_v58 }
 0xcd1   :  { %v1808_v8 = vpop.eup %1807 }
 0xcd2   :  { %v1285_v16 = vadd.f32 1.0, %v1808_v8 }
 0xcd4   :  { %v1287_v11 = vmul.f32 0.5, %v1285_v16 }
 0xcd6   :  { %v1289_v53 = vmul.f32 %v1287_v11, %v1270_v0 }
 0xcd8   :  { %v1290_v14 = vpack.c.bf16 %v1289_v53, %v1288_v12 }
 0xcda   :  { %1659 = vmatmul.msk.bf16.vlgmr.msrb.gmra.mxu3 %vm695_vm15, %v1290_v14 }
 0xd5d   :  { %v1341_v15 = vpop.f32.mrf.mxu3 }
 0xd5e   :  { %v1342_v42 = vadd.f32 %v1716_v19, %v1341_v15 }
 0xd60   :  { %v1346_v17 = vadd.f32 %v1342_v42, %v1230_v47 }
 0xd62   :  { %v1352_v18 = vsel %vm63_vm0, %v1346_v17, 0.0 }
 0xd63   :  { %1353 = vadd.xlane.f32.xlu1 %v1352_v18 }
 0xd65   :  { %v1343_v20 = vpop.f32.mrf.mxu3 }
 0xd66   :  { %v1344_v21 = vadd.f32 %v1716_v19, %v1343_v20 }
 0xd68   :  { %v1347_v23 = vadd.f32 %v1344_v21, %v1231_v48 }
 0xd6a   :  { %v1355_v24 = vsel %vm63_vm0, %v1347_v23, 0.0 }
 0xd6b   :  { %1356 = vadd.xlane.f32.xlu0 %v1355_v24 }
 0xdd6   :  { %v1354_v25 = vpop.xlane.xlu1 %1353 }
 0xdd7   :  { %v1358_v27 = vmul.f32 %v1354_v25, %v1943_v10 }
 0xdd9   :  { %v1360_v28 = vsub.f32 %v1346_v17, %v1358_v27 }
 0xddb   :  { %v1362_v29 = vmul.f32 %v1360_v28, %v1360_v28 }
 0xddd   :  { %v1364_v30 = vsel %vm63_vm0, %v1362_v29, 0.0 }
 0xdde   :  { %v1357_v31 = vpop.xlane.xlu0 %1356  ;;  %1365 = vadd.xlane.f32.xlu0 %v1364_v30 }
 0xddf   :  { %v1359_v32 = vmul.f32 %v1357_v31, %v1943_v10 }
 0xde1   :  { %v1361_v33 = vsub.f32 %v1347_v23, %v1359_v32 }
 0xde3   :  { %v1363_v34 = vmul.f32 %v1361_v33, %v1361_v33 }
 0xde5   :  { %v1367_v35 = vsel %vm63_vm0, %v1363_v34, 0.0 }
 0xde6   :  { %1368 = vadd.xlane.f32.xlu2 %v1367_v35 }
 0xe51   :  { %v1366_v36 = vpop.xlane.xlu0 %1365 }
 0xe52   :  { %v1370_v37 = vmul.f32 %v1366_v36, %v1943_v10 }
 0xe54   :  { %v1372_v38 = vadd.f32 1e-12, %v1370_v37 }
 0xe56   :  { %1809 = vrsqrt.f32 %v1372_v38  ;;  %vm1380_vm14 = vweird.f32 %v1372_v38 }
 0xe59   :  { %v1369_v39 = vpop.xlane.xlu2 %1368 }
 0xe5a   :  { %v1371_v40 = vmul.f32 %v1369_v39, %v1943_v10  ;;  %v1717_v10 = vld [vmem:[%s2332_s14 + $0x2] ss:$0 sm:$0xff] }
 0xe5c   :  { %v1810_v22 = vpop.eup %1809  ;;  %v1373_v41 = vadd.f32 1e-12, %v1371_v40 }
 0xe5d   :  { %v1375_v43 = vmul.f32 %v1810_v22, %v1372_v38  ;;  %vm1381_vm0 = vweird.f32 %v1810_v22 }
 0xe5e   :  { %1811 = vrsqrt.f32 %v1373_v41  ;;  %vm1382_vm15 = vmor %vm1380_vm14, %vm1381_vm0  ;;  %vm1390_vm2 = vweird.f32 %v1373_v41 }
 0xe5f   :  { %v1376_v44 = vmul.f32 %v1810_v22, %v1375_v43 }
 0xe61   :  { %v1377_v26 = vmul.f32 0.5, %v1376_v44 }
 0xe63   :  { %v1378_v54 = vsub.f32 1.5, %v1377_v26 }
 0xe64   :  { %v1812_v45 = vpop.eup %1811 }
 0xe65   :  { %v1385_v46 = vmul.f32 %v1812_v45, %v1373_v41  ;;  %v1379_v47 = vmul.f32 %v1810_v22, %v1378_v54  ;;  %vm1391_vm1 = vweird.f32 %v1812_v45 }
 0xe66   :  { %vm1392_vm3 = vmor %vm1390_vm2, %vm1391_vm1 }
 0xe67   :  { %v1386_v48 = vmul.f32 %v1812_v45, %v1385_v46  ;;  %v1383_v50 = vsel %vm1382_vm15, %v1810_v22, %v1379_v47 }
 0xe68   :  { %v1394_v55 = vmul.f32 %v1383_v50, %v1360_v28 }
 0xe69   :  { %v1387_v49 = vmul.f32 0.5, %v1386_v48 }
 0xe6a   :  { %v1399_v60 = vmul.f32 %v1717_v10, %v1394_v55 }
 0xe6b   :  { %v1388_v51 = vsub.f32 1.5, %v1387_v49 }
 0xe6c   :  { %v1404_v62 = vadd.f32 %v1718_v59, %v1399_v60 }
 0xe6d   :  { %v1389_v52 = vmul.f32 %v1812_v45, %v1388_v51 }
 0xe6f   :  { %v1393_v56 = vsel %vm1392_vm3, %v1812_v45, %v1389_v52 }
 0xe70   :  { %v1395_v57 = vmul.f32 %v1393_v56, %v1361_v33 }
 0xe72   :  { %v1400_v58 = vmul.f32 %v1717_v10, %v1395_v57 }
 0xe74   :  { %v1405_v61 = vadd.f32 %v1718_v59, %v1400_v58 }
 0xe76   :  { %1424 = vmatpush.msra.mxu0 %v1405_v61 }
 0xe78   :  { %1425 = vmatpush.msra.mxu0 %v1404_v62 }
 0xe79   :  { %1662 = vmatmul.msk.f32.vlgmr.msra.gmra.mxu0 %vm337_vm8, %v1406_v63 }
 0xef6   :  { %v1427_v0 = vpop.f32.mrf.mxu0 }
 0xef7   :  { %1431 = vst.msk [vmem:[#allocation2] sm:$0x3] %vm1430_vm4, %v1427_v0 }
 0xef8   :  { %1442 = dma.vmem_to_hbm [thread:$0]  %s1438_s29, 32, %s1440_s8, [#allocation3]  }
 0xef9   :  { %1841 = dma.done.wait [#allocation3], 32  }
 0xefa   :  { %1842 = vsyncadd [#allocation3], 4294967264 }
 0xefb   :  { %1447 = vsyncpa [#allocation3], 1 }

</bundles_post_ra>
